<compile_context>
chip_gen: v5e
topology: v5e:2x2
jax: 0.10.0
libtpu: 0.0.40
codegen_flags: <defaults>
</compile_context>

<pallas_src>
import functools

import jax
import jax.numpy as jnp
from jax.experimental import pallas as pl
from jax.experimental.pallas import tpu as pltpu


def _round_up(x: int, m: int) -> int:
    return (x + m - 1) // m * m


def mlp_kernel(x_ref, w1_ref, b1_ref, w2_ref, o_ref):
    # hidden = ReLU(dropout(x @ W1 + b1)); dropout is identity (eval mode).
    # TODO(synk): training-mode dropout (args.dropout_rate) omitted; eval semantics used.
    x = x_ref[...].astype(jnp.bfloat16)                   # cast in vregs; x stays f32 in HBM
    h = jnp.dot(x, w1_ref[...], preferred_element_type=jnp.float32)
    h = jnp.maximum(h + b1_ref[...], 0.0)                 # f32 VPU chain (v5e-safe), bias (1,H) broadcasts
    # out = ReLU(h @ W2_padded): W2 zero-padded to 128 lanes -> full-width, unmasked store.
    o = jnp.dot(h.astype(jnp.bfloat16), w2_ref[...], preferred_element_type=jnp.float32)
    o_ref[...] = jnp.maximum(o, 0.0).astype(o_ref.dtype)


def prepare_params(w1, b1, w2):
    """One-time parameter prep (do at init, NOT per forward call).

    Returns (w1_bf16, b1_f32 shape (1,H), w2_bf16 zero-padded to a multiple of 128 output lanes).
    Weights are stored transposed vs PyTorch: W1 is (input_dim, 256), W2 is (256, output_dim).
    """
    H = w1.shape[1]
    dout = w2.shape[1]
    dout_pad = _round_up(dout, 128)
    w2p = w2 if dout_pad == dout else jnp.pad(w2, ((0, 0), (0, dout_pad - dout)))
    return (
        w1.astype(jnp.bfloat16),
        b1.astype(jnp.float32).reshape(1, H),
        w2p.astype(jnp.bfloat16),
    )


def _pick_tm(batch: int, tm) -> int:
    # Explicit, legal user choice: multiple of 8 that divides B (e.g. tm=128 for v7x megacore).
    if tm is not None and 0 < tm < batch and tm % 8 == 0 and batch % tm == 0:
        return tm
    # Default: one whole-batch block while it comfortably fits VMEM (no per-step overhead).
    if batch <= 1024:
        return batch
    # Larger batches: biggest power-of-two tile that divides B (full blocks, real pipelining).
    for cand in (1024, 512, 256, 128, 64, 32, 16, 8):
        if batch % cand == 0:
            return cand
    return batch  # ragged batch: whole-batch block is always a legal block shape


@functools.partial(jax.jit, static_argnames=("dout", "tm"))
def mlp_pallas(x, w1b, b1_2d, w2b, *, dout=None, tm=None):
    B, Din = x.shape
    H = w1b.shape[1]
    dout_pad = w2b.shape[1]
    out_dtype = x.dtype

    tm_eff = _pick_tm(B, tm)
    grid = (B // tm_eff,)

    # VMEM budget: double-buffered x/out tiles + resident weights, with 2x headroom.
    # Derived explicitly so the limit is safe on v7x's 64 MiB VMEM (and raises v5e's 16 MiB default).
    tile_bytes = (tm_eff * Din * x.dtype.itemsize
                  + tm_eff * dout_pad * jnp.dtype(out_dtype).itemsize)
    weight_bytes = (w1b.size * w1b.dtype.itemsize
                    + b1_2d.size * b1_2d.dtype.itemsize
                    + w2b.size * w2b.dtype.itemsize)
    vmem_limit = int(min(max(2 * (2 * tile_bytes + weight_bytes), 16 * 1024 * 1024),
                         48 * 1024 * 1024))

    flops = 2 * B * (Din * H + H * dout_pad)
    bytes_accessed = (x.size * x.dtype.itemsize + weight_bytes
                      + B * dout_pad * jnp.dtype(out_dtype).itemsize)

    out = pl.pallas_call(
        mlp_kernel,
        out_shape=jax.ShapeDtypeStruct((B, dout_pad), out_dtype),
        grid_spec=pl.GridSpec(
            grid=grid,
            in_specs=[
                pl.BlockSpec((tm_eff, Din), lambda i: (i, 0)),    # x: tiled over batch, f32 in HBM
                pl.BlockSpec((Din, H), lambda i: (0, 0)),         # W1 (bf16): VMEM-resident
                pl.BlockSpec((1, H), lambda i: (0, 0)),           # b1 (f32): VMEM-resident
                pl.BlockSpec((H, dout_pad), lambda i: (0, 0)),    # W2 (bf16, lane-padded): VMEM-resident
            ],
            out_specs=pl.BlockSpec((tm_eff, dout_pad), lambda i: (i, 0)),  # lane-dense store
        ),
        compiler_params=pltpu.CompilerParams(
            dimension_semantics=("parallel",),    # batch tiles are independent (v7x: 2 TCs)
            vmem_limit_bytes=vmem_limit,
        ),
        cost_estimate=pl.CostEstimate(
            flops=flops, transcendentals=0, bytes_accessed=bytes_accessed
        ),
    )(x, w1b, b1_2d, w2b)

    if dout is not None and dout != dout_pad:
        out = out[:, :dout]       # tiny copy; the kernel-side store stays lane-dense
    return out


def mlp_reference(x, w1, b1, w2):
    # Same numerics as the kernel: bf16 MXU inputs, f32 accumulation, f32 elementwise.
    xb = x.astype(jnp.bfloat16)
    w1b = w1.astype(jnp.bfloat16)
    w2b = w2.astype(jnp.bfloat16)
    h = jnp.maximum(
        jnp.dot(xb, w1b, preferred_element_type=jnp.float32) + b1.astype(jnp.float32), 0.0
    )
    o = jnp.dot(h.astype(jnp.bfloat16), w2b, preferred_element_type=jnp.float32)
    return jnp.maximum(o, 0.0).astype(x.dtype)


if __name__ == "__main__":
    # hidden=256 is fixed by the module; Din/Dout/B kept small but chosen so both the
    # single-block and the tiled (multi-step grid) code paths get exercised.
    B, Din, H, Dout = 512, 32, 256, 16

    key = jax.random.PRNGKey(0)
    kx, kw1, kb1, kw2 = jax.random.split(key, 4)

    x = jax.random.normal(kx, (B, Din), dtype=jnp.float32)

    # Deterministic init mimicking PyTorch Linear default: U(-1/sqrt(fan_in), 1/sqrt(fan_in)).
    lim1 = 1.0 / (Din ** 0.5)
    lim2 = 1.0 / (H ** 0.5)
    w1 = jax.random.uniform(kw1, (Din, H), minval=-lim1, maxval=lim1, dtype=jnp.float32)
    b1 = jax.random.uniform(kb1, (H,), minval=-lim1, maxval=lim1, dtype=jnp.float32)
    w2 = jax.random.uniform(kw2, (H, Dout), minval=-lim2, maxval=lim2, dtype=jnp.float32)

    # One-time weight prep (bf16 cast + lane padding) -- amortized across all forward calls.
    w1b, b1_2d, w2b = jax.block_until_ready(prepare_params(w1, b1, w2))

    # Default: single whole-batch block (best on 1-TC v5e/v6e at this size).
    out = jax.block_until_ready(mlp_pallas(x, w1b, b1_2d, w2b, dout=Dout))
    # Tiled: 4 grid steps (>= 2 tiles per core for v7x megacore).
    out_tiled = jax.block_until_ready(mlp_pallas(x, w1b, b1_2d, w2b, dout=Dout, tm=128))

    ref = mlp_reference(x, w1, b1, w2)
    assert out.shape == (B, Dout)
    assert jnp.allclose(out, ref, atol=1e-2, rtol=1e-2), "mismatch vs reference (single block)"
    assert jnp.allclose(out_tiled, ref, atol=1e-2, rtol=1e-2), "mismatch vs reference (tiled)"

    print("KERNEL_OK")
</pallas_src>

<mosaic_0001>
module attributes {stable_mosaic.version = 11 : i64} {
  func.func @mlp_kernel(%arg0: i32, %arg1: memref<512x32xf32, #tpu.memory_space<vmem>>, %arg2: memref<32x256xbf16, #tpu.memory_space<vmem>>, %arg3: memref<1x256xf32, #tpu.memory_space<vmem>>, %arg4: memref<256x128xbf16, #tpu.memory_space<vmem>>, %arg5: memref<512x128xf32, #tpu.memory_space<vmem>>) attributes {dimension_semantics = [#tpu.dimension_semantics<parallel>], iteration_bounds = array<i64: 1>, scalar_prefetch = 0 : i64, scratch_operands = 0 : i64, tpu.core_type = #tpu.core_type<tc>, window_params = [{transform_indices = @transform_0, window_bounds = array<i64: 512, 32>}, {pipeline_mode = #tpu.pipeline_mode<synchronous>, transform_indices = @transform_1, window_bounds = array<i64: 32, 256>}, {pipeline_mode = #tpu.pipeline_mode<synchronous>, transform_indices = @transform_2, window_bounds = array<i64: 1, 256>}, {pipeline_mode = #tpu.pipeline_mode<synchronous>, transform_indices = @transform_3, window_bounds = array<i64: 256, 128>}, {transform_indices = @transform_4, window_bounds = array<i64: 512, 128>}]} {
    %c0 = arith.constant 0 : index
    %c0_0 = arith.constant 0 : index
    %0 = vector.load %arg1[%c0, %c0_0] : memref<512x32xf32, #tpu.memory_space<vmem>>, vector<512x32xf32>
    %1 = arith.truncf %0 : vector<512x32xf32> to vector<512x32xbf16>
    %c0_1 = arith.constant 0 : index
    %c0_2 = arith.constant 0 : index
    %2 = vector.load %arg2[%c0_1, %c0_2] : memref<32x256xbf16, #tpu.memory_space<vmem>>, vector<32x256xbf16>
    %cst = arith.constant dense<0.000000e+00> : vector<512x256xf32>
    %3 = tpu.matmul %1, %2, %cst {dimension_numbers = #tpu.dot_dimension_numbers<[1], [0], [0], [1], [0, 0, 1, 1], [], []>} : vector<512x32xbf16>, vector<32x256xbf16>, vector<512x256xf32> -> vector<512x256xf32>
    %c0_3 = arith.constant 0 : index
    %c0_4 = arith.constant 0 : index
    %4 = vector.load %arg3[%c0_3, %c0_4] : memref<1x256xf32, #tpu.memory_space<vmem>>, vector<1x256xf32>
    %5 = vector.broadcast %4 : vector<1x256xf32> to vector<512x256xf32>
    %6 = arith.addf %3, %5 : vector<512x256xf32>
    %cst_5 = arith.constant 0.000000e+00 : f32
    %7 = vector.broadcast %cst_5 : f32 to vector<512x256xf32>
    %8 = arith.maximumf %6, %7 : vector<512x256xf32>
    %9 = arith.truncf %8 : vector<512x256xf32> to vector<512x256xbf16>
    %c0_6 = arith.constant 0 : index
    %c0_7 = arith.constant 0 : index
    %10 = vector.load %arg4[%c0_6, %c0_7] : memref<256x128xbf16, #tpu.memory_space<vmem>>, vector<256x128xbf16>
    %cst_8 = arith.constant dense<0.000000e+00> : vector<512x128xf32>
    %11 = tpu.matmul %9, %10, %cst_8 {dimension_numbers = #tpu.dot_dimension_numbers<[1], [0], [0], [1], [0, 0, 1, 1], [], []>} : vector<512x256xbf16>, vector<256x128xbf16>, vector<512x128xf32> -> vector<512x128xf32>
    %cst_9 = arith.constant 0.000000e+00 : f32
    %12 = vector.broadcast %cst_9 : f32 to vector<512x128xf32>
    %13 = arith.maximumf %11, %12 : vector<512x128xf32>
    %c0_10 = arith.constant 0 : index
    %c0_11 = arith.constant 0 : index
    %14 = vector.load %arg5[%c0_10, %c0_11] : memref<512x128xf32, #tpu.memory_space<vmem>>, vector<512x128xf32>
    tpu.vector_store %arg5[%c0_10, %c0_11], %13 {strides = array<i32>} : memref<512x128xf32, #tpu.memory_space<vmem>>, vector<512x128xf32>,
    return
  }
  func.func @transform_0(%arg0: i32) -> (i32, i32) {
    %c0_i32 = arith.constant 0 : i32
    %c0_i32_0 = arith.constant 0 : i32
    return %arg0, %c0_i32 : i32, i32
  }
  func.func @transform_1(%arg0: i32) -> (i32, i32) {
    %c0_i32 = arith.constant 0 : i32
    %c0_i32_0 = arith.constant 0 : i32
    %c0_i32_1 = arith.constant 0 : i32
    return %c0_i32, %c0_i32_0 : i32, i32
  }
  func.func @transform_2(%arg0: i32) -> (i32, i32) {
    %c0_i32 = arith.constant 0 : i32
    %c0_i32_0 = arith.constant 0 : i32
    %c0_i32_1 = arith.constant 0 : i32
    return %c0_i32, %c0_i32_0 : i32, i32
  }
  func.func @transform_3(%arg0: i32) -> (i32, i32) {
    %c0_i32 = arith.constant 0 : i32
    %c0_i32_0 = arith.constant 0 : i32
    %c0_i32_1 = arith.constant 0 : i32
    return %c0_i32, %c0_i32_0 : i32, i32
  }
  func.func @transform_4(%arg0: i32) -> (i32, i32) {
    %c0_i32 = arith.constant 0 : i32
    %c0_i32_0 = arith.constant 0 : i32
    return %arg0, %c0_i32 : i32, i32
  }
}

</mosaic_0001>

<bundles_post_ra>
// kernel: mlp_pallas.1
= control target key start
LH: loop header
LB: loop body
LE: loop exit
PB: predicated region body
PF: predicated region fallthrough
CT: control target
= control target key end

     0   :  { %vm144_vm0 = vcmask 261120   ;;  %s2213_s1 = inlined_call_operand.vmem [shape: bf16[32,256], index: 1, kind: input, shape index: {}]   ;;  %s2214_s0 = inlined_call_operand.vmem [shape: f32[512,32], index: 0, kind: input, shape index: {}]   ;;  %s2215_s3 = inlined_call_operand.vmem [shape: bf16[256,128], index: 3, kind: input, shape index: {}]   ;;  %s2216_s2 = inlined_call_operand.vmem [shape: f32[1,256], index: 2, kind: input, shape index: {}]   ;;  %s2217_s4 = inlined_call_operand.vmem [shape: f32[512,128], index: 4, kind: output, shape index: {}]  }
   0x1   :  { %v1379_v0 = vld [vmem:[%s2213_s1 + $0x10] sm:$0xf]  ;;  %v1516_v1 = vld [vmem:[%s2213_s1 + $0x14] sm:$0xf0]  ;;  %v1515_v2 = vld [vmem:[%s2213_s1 + $0x14] sm:$0xf] }
   0x2   :  { %v1380_v3 = vor.u32 %v1516_v1, %v1379_v0  ;;  %v1381_v4 = vld [vmem:[%s2213_s1 + $0x18] sm:$0xf0]  ;;  %v1371_v5 = vld [vmem:[%s2213_s1] sm:$0xf]  ;;  %v1514_v6 = vld [vmem:[%s2213_s1 + $0x4] sm:$0xf0] }
   0x3   :  { %v1384_v7 = vor.u32 %v1515_v2, %v1381_v4  ;;  %v1513_v8 = vld [vmem:[%s2213_s1 + $0x4] sm:$0xf]  ;;  %v1373_v9 = vld [vmem:[%s2213_s1 + $0x8] sm:$0xf0]  ;;  %v1372_v10 = vor.u32 %v1514_v6, %v1371_v5  ;;  %v20_v15 = vld [vmem:[%s2214_s0 + $0x10] sm:$0xff] }
   0x4   :  { %247 = vmatpush.bf16.msra.mxu0 %v1380_v3  ;;  %v18_v11 = vld [vmem:[%s2214_s0] sm:$0xff]  ;;  %v19_v12 = vld [vmem:[%s2214_s0 + $0x8] sm:$0xff]  ;;  %v1376_v13 = vor.u32 %v1513_v8, %v1373_v9  ;;  %v21_v16 = vld [vmem:[%s2214_s0 + $0x18] sm:$0xff] }
   0x5   :  { %416 = vmatpush.bf16.msra.mxu1 %v1384_v7  ;;  %v82_v14 = vpack.c.bf16 %v19_v12, %v18_v11  ;;  %v83_v17 = vpack.c.bf16 %v21_v16, %v20_v15  ;;  %v22_v18 = vld [vmem:[%s2214_s0 + $0x20] sm:$0xff]  ;;  %v23_v19 = vld [vmem:[%s2214_s0 + $0x28] sm:$0xff]  ;;  %v24_v21 = vld [vmem:[%s2214_s0 + $0x30] sm:$0xff] }
   0x6   :  { %v84_v20 = vpack.c.bf16 %v23_v19, %v22_v18  ;;  %v25_v22 = vld [vmem:[%s2214_s0 + $0x38] sm:$0xff]  ;;  %v26_v24 = vld [vmem:[%s2214_s0 + $0x40] sm:$0xff]  ;;  %v27_v25 = vld [vmem:[%s2214_s0 + $0x48] sm:$0xff] }
   0x7   :  { %v85_v23 = vpack.c.bf16 %v25_v22, %v24_v21  ;;  %v86_v26 = vpack.c.bf16 %v27_v25, %v26_v24  ;;  %v1524_v27 = vld [vmem:[%s2215_s3 + $0x38] sm:$0xff]  ;;  %v28_v29 = vld [vmem:[%s2214_s0 + $0x50] sm:$0xff]  ;;  %v1522_v34 = vld [vmem:[%s2215_s3 + $0x28] sm:$0xff] }
   0x8   :  { %248 = vmatpush.bf16.msra.mxu0 %v1372_v10  ;;  %v1532_v28 = vld [vmem:[%s2215_s3 + $0x78] sm:$0xff]  ;;  %899 = vmatpush.bf16.msra.mxu2 %v1524_v27  ;;  %v1523_v32 = vld [vmem:[%s2215_s3 + $0x30] sm:$0xff]  ;;  %v1530_v35 = vld [vmem:[%s2215_s3 + $0x68] sm:$0xff] }
   0x9   :  { %417 = vmatpush.bf16.msra.mxu1 %v1376_v13  ;;  %1068 = vmatpush.bf16.msra.mxu3 %v1532_v28  ;;  %v29_v30 = vld [vmem:[%s2214_s0 + $0x58] sm:$0xff]  ;;  %v1531_v33 = vld [vmem:[%s2215_s3 + $0x70] sm:$0xff]  ;;  %v1521_v36 = vld [vmem:[%s2215_s3 + $0x20] sm:$0xff] }
   0xa   :  { %v87_v31 = vpack.c.bf16 %v29_v30, %v28_v29  ;;  %v1529_v37 = vld [vmem:[%s2215_s3 + $0x60] sm:$0xff]  ;;  %v31_v39 = vld [vmem:[%s2214_s0 + $0x68] sm:$0xff]  ;;  %v1520_v41 = vld [vmem:[%s2215_s3 + $0x18] sm:$0xff] }
   0xb   :  { %1385 = vmatmul.msk.bf16.vlgmr.msra.gmra.mxu0 %vm144_vm0, %v82_v14  ;;  %v30_v38 = vld [vmem:[%s2214_s0 + $0x60] sm:$0xff]  ;;  %v1528_v42 = vld [vmem:[%s2215_s3 + $0x58] sm:$0xff]  ;;  %v1519_v43 = vld [vmem:[%s2215_s3 + $0x10] sm:$0xff] }
   0xc   :  { %1417 = vmatmul.msk.bf16.vlgmr.msra.gmra.mxu1 %vm144_vm0, %v82_v14  ;;  %900 = vmatpush.bf16.msra.mxu2 %v1523_v32  ;;  %v88_v40 = vpack.c.bf16 %v31_v39, %v30_v38  ;;  %v1527_v44 = vld [vmem:[%s2215_s3 + $0x50] sm:$0xff]  ;;  %v1518_v45 = vld [vmem:[%s2215_s3 + $0x8] sm:$0xff]  ;;  %v1517_v47 = vld [vmem:[%s2215_s3] sm:$0xff] }
   0xd   :  { %1069 = vmatpush.bf16.msra.mxu3 %v1531_v33  ;;  %v1526_v46 = vld [vmem:[%s2215_s3 + $0x48] sm:$0xff]  ;;  %v1525_v48 = vld [vmem:[%s2215_s3 + $0x40] sm:$0xff]  ;;  %v32_v49 = vld [vmem:[%s2214_s0 + $0x70] sm:$0xff] }
   0xe   :  { %v33_v50 = vld [vmem:[%s2214_s0 + $0x78] sm:$0xff]  ;;  %v34_v52 = vld [vmem:[%s2214_s0 + $0x80] sm:$0xff]  ;;  %v35_v53 = vld [vmem:[%s2214_s0 + $0x88] sm:$0xff] }
   0xf   :  { %v89_v51 = vpack.c.bf16 %v33_v50, %v32_v49  ;;  %v90_v54 = vpack.c.bf16 %v35_v53, %v34_v52  ;;  %v118_v55 = vld [vmem:[%s2216_s2] sm:$0x3]  ;;  %v36_v6 = vld [vmem:[%s2214_s0 + $0x90] sm:$0xff]  ;;  %v37_v7 = vld [vmem:[%s2214_s0 + $0x98] sm:$0xff] }
  0x10   :  { %901 = vmatpush.bf16.msra.mxu2 %v1522_v34  ;;  %v1703_v58 = vperm.slane %v118_v55, 0  ;;  %v1706_v59 = vperm.slane %v118_v55, 1  ;;  %v91_v10 = vpack.c.bf16 %v37_v7, %v36_v6  ;;  %v39_v24 = vld [vmem:[%s2214_s0 + $0xa8] sm:$0xff] }
  0x11   :  { %1070 = vmatpush.bf16.msra.mxu3 %v1530_v35 }
  0x14   :  { %902 = vmatpush.bf16.msra.mxu2 %v1521_v36 }
  0x15   :  { %1071 = vmatpush.bf16.msra.mxu3 %v1529_v37 }
  0x18   :  { %903 = vmatpush.bf16.msra.mxu2 %v1520_v41  ;;  %v41_v41 = vld [vmem:[%s2214_s0 + $0xb8] sm:$0xff] }
  0x19   :  { %1072 = vmatpush.bf16.msra.mxu3 %v1528_v42 }
  0x1b   :  { %1386 = vmatmul.msk.bf16.gmra.mxu0 %vm144_vm0, %v83_v17 }
  0x1c   :  { %1418 = vmatmul.msk.bf16.gmra.mxu1 %vm144_vm0, %v83_v17  ;;  %904 = vmatpush.bf16.msra.mxu2 %v1519_v43 }
  0x1d   :  { %1073 = vmatpush.bf16.msra.mxu3 %v1527_v44 }
  0x20   :  { %905 = vmatpush.bf16.msra.mxu2 %v1518_v45 }
  0x21   :  { %1074 = vmatpush.bf16.msra.mxu3 %v1526_v46 }
  0x24   :  { %906 = vmatpush.bf16.msra.mxu2 %v1517_v47 }
  0x25   :  { %1075 = vmatpush.bf16.msra.mxu3 %v1525_v48 }
  0x2b   :  { %1387 = vmatmul.msk.bf16.gmra.mxu0 %vm144_vm0, %v84_v20 }
  0x2c   :  { %1419 = vmatmul.msk.bf16.gmra.mxu1 %vm144_vm0, %v84_v20 }
  0x3b   :  { %1388 = vmatmul.msk.bf16.gmra.mxu0 %vm144_vm0, %v85_v23 }
  0x3c   :  { %1420 = vmatmul.msk.bf16.gmra.mxu1 %vm144_vm0, %v85_v23  ;;  %v38_v23 = vld [vmem:[%s2214_s0 + $0xa0] sm:$0xff] }
  0x3d   :  { %v92_v27 = vpack.c.bf16 %v39_v24, %v38_v23 }
  0x4b   :  { %1389 = vmatmul.msk.bf16.gmra.mxu0 %vm144_vm0, %v86_v26 }
  0x4c   :  { %1421 = vmatmul.msk.bf16.gmra.mxu1 %vm144_vm0, %v86_v26 }
  0x5b   :  { %1390 = vmatmul.msk.bf16.gmra.mxu0 %vm144_vm0, %v87_v31 }
  0x5c   :  { %1422 = vmatmul.msk.bf16.gmra.mxu1 %vm144_vm0, %v87_v31 }
  0x6b   :  { %1391 = vmatmul.msk.bf16.gmra.mxu0 %vm144_vm0, %v88_v40 }
  0x6c   :  { %1423 = vmatmul.msk.bf16.gmra.mxu1 %vm144_vm0, %v88_v40  ;;  %v40_v40 = vld [vmem:[%s2214_s0 + $0xb0] sm:$0xff] }
  0x6d   :  { %v93_v44 = vpack.c.bf16 %v41_v41, %v40_v40 }
  0x7b   :  { %1392 = vmatmul.msk.bf16.gmra.mxu0 %vm144_vm0, %v89_v51 }
  0x7c   :  { %1424 = vmatmul.msk.bf16.gmra.mxu1 %vm144_vm0, %v89_v51 }
  0x88   :  { %v250_v56 = vpop.f32.mrf.mxu0 }
  0x89   :  { %v419_v57 = vpop.f32.mrf.mxu1  ;;  %v251_v60 = vadd.f32 %v250_v56, %v1703_v58 }
  0x8a   :  { %v420_v61 = vadd.f32 %v419_v57, %v1706_v59  ;;  %v42_v57 = vld [vmem:[%s2214_s0 + $0xc0] sm:$0xff] }
  0x8b   :  { %1393 = vmatmul.msk.bf16.gmra.mxu0 %vm144_vm0, %v90_v54  ;;  %v579_v2 = vmax.f32 %v251_v60, 0.0  ;;  %v43_v60 = vld [vmem:[%s2214_s0 + $0xc8] sm:$0xff] }
  0x8c   :  { %1425 = vmatmul.msk.bf16.gmra.mxu1 %vm144_vm0, %v90_v54  ;;  %v580_v4 = vmax.f32 %v420_v61, 0.0 }
  0x90   :  { %v252_v62 = vpop.f32.mrf.mxu0 }
  0x91   :  { %v253_v63 = vadd.f32 %v252_v62, %v1703_v58  ;;  %v421_v0 = vpop.f32.mrf.mxu1 }
  0x92   :  { %v422_v1 = vadd.f32 %v421_v0, %v1706_v59 }
  0x93   :  { %v581_v3 = vmax.f32 %v253_v63, 0.0  ;;  %v94_v63 = vpack.c.bf16 %v43_v60, %v42_v57 }
  0x94   :  { %v582_v5 = vmax.f32 %v422_v1, 0.0 }
  0x95   :  { %v707_v8 = vpack.c.bf16 %v581_v3, %v579_v2 }
  0x96   :  { %v708_v9 = vpack.c.bf16 %v582_v5, %v580_v4 }
  0x97   :  { %907 = vmatmul.bf16.vlgmr.msra.gmra.mxu2 %v707_v8 }
  0x98   :  { %1076 = vmatmul.bf16.vlgmr.msra.gmra.mxu3 %v708_v9  ;;  %v255_v11 = vpop.f32.mrf.mxu0 }
  0x99   :  { %v424_v12 = vpop.f32.mrf.mxu1  ;;  %v256_v13 = vadd.f32 %v255_v11, %v1703_v58 }
  0x9a   :  { %v425_v14 = vadd.f32 %v424_v12, %v1706_v59  ;;  %v44_v12 = vld [vmem:[%s2214_s0 + $0xd0] sm:$0xff] }
  0x9b   :  { %1394 = vmatmul.msk.bf16.gmra.mxu0 %vm144_vm0, %v91_v10  ;;  %v583_v19 = vmax.f32 %v256_v13, 0.0  ;;  %v45_v13 = vld [vmem:[%s2214_s0 + $0xd8] sm:$0xff] }
  0x9c   :  { %1426 = vmatmul.msk.bf16.gmra.mxu1 %vm144_vm0, %v91_v10  ;;  %v584_v21 = vmax.f32 %v425_v14, 0.0 }
  0xa0   :  { %v257_v15 = vpop.f32.mrf.mxu0 }
  0xa1   :  { %v258_v16 = vadd.f32 %v257_v15, %v1703_v58  ;;  %v426_v17 = vpop.f32.mrf.mxu1 }
  0xa2   :  { %v427_v18 = vadd.f32 %v426_v17, %v1706_v59 }
  0xa3   :  { %v585_v20 = vmax.f32 %v258_v16, 0.0  ;;  %v95_v16 = vpack.c.bf16 %v45_v13, %v44_v12 }
  0xa4   :  { %v586_v22 = vmax.f32 %v427_v18, 0.0 }
  0xa5   :  { %v709_v25 = vpack.c.bf16 %v585_v20, %v583_v19 }
  0xa6   :  { %v710_v26 = vpack.c.bf16 %v586_v22, %v584_v21 }
  0xa7   :  { %912 = vmatmul.bf16.gmra.mxu2 %v709_v25 }
  0xa8   :  { %1081 = vmatmul.bf16.gmra.mxu3 %v710_v26  ;;  %v260_v28 = vpop.f32.mrf.mxu0 }
  0xa9   :  { %v429_v29 = vpop.f32.mrf.mxu1  ;;  %v261_v30 = vadd.f32 %v260_v28, %v1703_v58 }
  0xaa   :  { %v430_v31 = vadd.f32 %v429_v29, %v1706_v59  ;;  %v46_v29 = vld [vmem:[%s2214_s0 + $0xe0] sm:$0xff] }
  0xab   :  { %1395 = vmatmul.msk.bf16.gmra.mxu0 %vm144_vm0, %v92_v27  ;;  %v587_v36 = vmax.f32 %v261_v30, 0.0  ;;  %v47_v30 = vld [vmem:[%s2214_s0 + $0xe8] sm:$0xff] }
  0xac   :  { %1427 = vmatmul.msk.bf16.gmra.mxu1 %vm144_vm0, %v92_v27  ;;  %v588_v38 = vmax.f32 %v430_v31, 0.0 }
  0xb0   :  { %v262_v32 = vpop.f32.mrf.mxu0 }
  0xb1   :  { %v263_v33 = vadd.f32 %v262_v32, %v1703_v58  ;;  %v431_v34 = vpop.f32.mrf.mxu1 }
  0xb2   :  { %v432_v35 = vadd.f32 %v431_v34, %v1706_v59 }
  0xb3   :  { %v589_v37 = vmax.f32 %v263_v33, 0.0  ;;  %v96_v33 = vpack.c.bf16 %v47_v30, %v46_v29 }
  0xb4   :  { %v590_v39 = vmax.f32 %v432_v35, 0.0 }
  0xb5   :  { %v711_v42 = vpack.c.bf16 %v589_v37, %v587_v36 }
  0xb6   :  { %v712_v43 = vpack.c.bf16 %v590_v39, %v588_v38 }
  0xb7   :  { %917 = vmatmul.bf16.gmra.mxu2 %v711_v42 }
  0xb8   :  { %1086 = vmatmul.bf16.gmra.mxu3 %v712_v43  ;;  %v265_v45 = vpop.f32.mrf.mxu0 }
  0xb9   :  { %v434_v46 = vpop.f32.mrf.mxu1  ;;  %v266_v47 = vadd.f32 %v265_v45, %v1703_v58 }
  0xba   :  { %v435_v48 = vadd.f32 %v434_v46, %v1706_v59  ;;  %v48_v46 = vld [vmem:[%s2214_s0 + $0xf0] sm:$0xff] }
  0xbb   :  { %1396 = vmatmul.msk.bf16.gmra.mxu0 %vm144_vm0, %v93_v44  ;;  %v591_v53 = vmax.f32 %v266_v47, 0.0  ;;  %v49_v47 = vld [vmem:[%s2214_s0 + $0xf8] sm:$0xff] }
  0xbc   :  { %1428 = vmatmul.msk.bf16.gmra.mxu1 %vm144_vm0, %v93_v44  ;;  %v592_v55 = vmax.f32 %v435_v48, 0.0 }
  0xc0   :  { %v267_v49 = vpop.f32.mrf.mxu0 }
  0xc1   :  { %v268_v50 = vadd.f32 %v267_v49, %v1703_v58  ;;  %v436_v51 = vpop.f32.mrf.mxu1 }
  0xc2   :  { %v437_v52 = vadd.f32 %v436_v51, %v1706_v59 }
  0xc3   :  { %v593_v54 = vmax.f32 %v268_v50, 0.0  ;;  %v97_v50 = vpack.c.bf16 %v49_v47, %v48_v46 }
  0xc4   :  { %v594_v56 = vmax.f32 %v437_v52, 0.0 }
  0xc5   :  { %v713_v61 = vpack.c.bf16 %v593_v54, %v591_v53 }
  0xc6   :  { %v714_v62 = vpack.c.bf16 %v594_v56, %v592_v55 }
  0xc7   :  { %922 = vmatmul.bf16.gmra.mxu2 %v713_v61 }
  0xc8   :  { %1091 = vmatmul.bf16.gmra.mxu3 %v714_v62  ;;  %v270_v0 = vpop.f32.mrf.mxu0 }
  0xc9   :  { %v439_v1 = vpop.f32.mrf.mxu1  ;;  %v271_v2 = vadd.f32 %v270_v0, %v1703_v58 }
  0xca   :  { %v440_v3 = vadd.f32 %v439_v1, %v1706_v59  ;;  %v50_v1 = vld [vmem:[%s2214_s0 + $0x100] sm:$0xff] }
  0xcb   :  { %1397 = vmatmul.msk.bf16.gmra.mxu0 %vm144_vm0, %v94_v63  ;;  %v595_v8 = vmax.f32 %v271_v2, 0.0  ;;  %v51_v2 = vld [vmem:[%s2214_s0 + $0x108] sm:$0xff] }
  0xcc   :  { %1429 = vmatmul.msk.bf16.gmra.mxu1 %vm144_vm0, %v94_v63  ;;  %v596_v10 = vmax.f32 %v440_v3, 0.0 }
  0xd0   :  { %v272_v4 = vpop.f32.mrf.mxu0 }
  0xd1   :  { %v273_v5 = vadd.f32 %v272_v4, %v1703_v58  ;;  %v441_v6 = vpop.f32.mrf.mxu1 }
  0xd2   :  { %v442_v7 = vadd.f32 %v441_v6, %v1706_v59 }
  0xd3   :  { %v597_v9 = vmax.f32 %v273_v5, 0.0  ;;  %v98_v5 = vpack.c.bf16 %v51_v2, %v50_v1 }
  0xd4   :  { %v598_v11 = vmax.f32 %v442_v7, 0.0 }
  0xd5   :  { %v715_v14 = vpack.c.bf16 %v597_v9, %v595_v8 }
  0xd6   :  { %v716_v15 = vpack.c.bf16 %v598_v11, %v596_v10 }
  0xd7   :  { %927 = vmatmul.bf16.gmra.mxu2 %v715_v14 }
  0xd8   :  { %1096 = vmatmul.bf16.gmra.mxu3 %v716_v15  ;;  %v275_v17 = vpop.f32.mrf.mxu0 }
  0xd9   :  { %v444_v18 = vpop.f32.mrf.mxu1  ;;  %v276_v19 = vadd.f32 %v275_v17, %v1703_v58 }
  0xda   :  { %v445_v20 = vadd.f32 %v444_v18, %v1706_v59  ;;  %v52_v18 = vld [vmem:[%s2214_s0 + $0x110] sm:$0xff] }
  0xdb   :  { %1398 = vmatmul.msk.bf16.gmra.mxu0 %vm144_vm0, %v95_v16  ;;  %v599_v25 = vmax.f32 %v276_v19, 0.0  ;;  %v53_v19 = vld [vmem:[%s2214_s0 + $0x118] sm:$0xff] }
  0xdc   :  { %1430 = vmatmul.msk.bf16.gmra.mxu1 %vm144_vm0, %v95_v16  ;;  %v600_v27 = vmax.f32 %v445_v20, 0.0 }
  0xe0   :  { %v277_v21 = vpop.f32.mrf.mxu0 }
  0xe1   :  { %v278_v22 = vadd.f32 %v277_v21, %v1703_v58  ;;  %v446_v23 = vpop.f32.mrf.mxu1 }
  0xe2   :  { %v447_v24 = vadd.f32 %v446_v23, %v1706_v59 }
  0xe3   :  { %v601_v26 = vmax.f32 %v278_v22, 0.0  ;;  %v99_v22 = vpack.c.bf16 %v53_v19, %v52_v18 }
  0xe4   :  { %v602_v28 = vmax.f32 %v447_v24, 0.0 }
  0xe5   :  { %v717_v31 = vpack.c.bf16 %v601_v26, %v599_v25 }
  0xe6   :  { %v718_v32 = vpack.c.bf16 %v602_v28, %v600_v27 }
  0xe7   :  { %932 = vmatmul.bf16.gmra.mxu2 %v717_v31 }
  0xe8   :  { %1101 = vmatmul.bf16.gmra.mxu3 %v718_v32  ;;  %v280_v34 = vpop.f32.mrf.mxu0 }
  0xe9   :  { %v449_v35 = vpop.f32.mrf.mxu1  ;;  %v281_v36 = vadd.f32 %v280_v34, %v1703_v58 }
  0xea   :  { %v450_v37 = vadd.f32 %v449_v35, %v1706_v59 }
  0xeb   :  { %1399 = vmatmul.msk.bf16.gmra.mxu0 %vm144_vm0, %v96_v33  ;;  %v603_v42 = vmax.f32 %v281_v36, 0.0 }
  0xec   :  { %1431 = vmatmul.msk.bf16.gmra.mxu1 %vm144_vm0, %v96_v33  ;;  %v604_v44 = vmax.f32 %v450_v37, 0.0 }
  0xf0   :  { %v282_v38 = vpop.f32.mrf.mxu0 }
  0xf1   :  { %v283_v39 = vadd.f32 %v282_v38, %v1703_v58  ;;  %v451_v40 = vpop.f32.mrf.mxu1 }
  0xf2   :  { %v452_v41 = vadd.f32 %v451_v40, %v1706_v59 }
  0xf3   :  { %v605_v43 = vmax.f32 %v283_v39, 0.0 }
  0xf4   :  { %v606_v45 = vmax.f32 %v452_v41, 0.0 }
  0xf5   :  { %v719_v48 = vpack.c.bf16 %v605_v43, %v603_v42  ;;  %v54_v42 = vld [vmem:[%s2214_s0 + $0x120] sm:$0xff]  ;;  %v55_v43 = vld [vmem:[%s2214_s0 + $0x128] sm:$0xff] }
  0xf6   :  { %v720_v49 = vpack.c.bf16 %v606_v45, %v604_v44  ;;  %v100_v47 = vpack.c.bf16 %v55_v43, %v54_v42 }
  0xf7   :  { %937 = vmatmul.bf16.gmra.mxu2 %v719_v48 }
  0xf8   :  { %1106 = vmatmul.bf16.gmra.mxu3 %v720_v49  ;;  %v285_v51 = vpop.f32.mrf.mxu0 }
  0xf9   :  { %v454_v52 = vpop.f32.mrf.mxu1  ;;  %v286_v53 = vadd.f32 %v285_v51, %v1703_v58 }
  0xfa   :  { %v455_v54 = vadd.f32 %v454_v52, %v1706_v59 }
  0xfb   :  { %1400 = vmatmul.msk.bf16.gmra.mxu0 %vm144_vm0, %v97_v50  ;;  %v607_v61 = vmax.f32 %v286_v53, 0.0 }
  0xfc   :  { %1432 = vmatmul.msk.bf16.gmra.mxu1 %vm144_vm0, %v97_v50  ;;  %v608_v63 = vmax.f32 %v455_v54, 0.0 }
 0x100   :  { %v287_v55 = vpop.f32.mrf.mxu0 }
 0x101   :  { %v288_v56 = vadd.f32 %v287_v55, %v1703_v58  ;;  %v456_v57 = vpop.f32.mrf.mxu1 }
 0x102   :  { %v457_v60 = vadd.f32 %v456_v57, %v1706_v59 }
 0x103   :  { %v609_v62 = vmax.f32 %v288_v56, 0.0 }
 0x104   :  { %v610_v0 = vmax.f32 %v457_v60, 0.0 }
 0x105   :  { %v721_v3 = vpack.c.bf16 %v609_v62, %v607_v61 }
 0x106   :  { %v722_v4 = vpack.c.bf16 %v610_v0, %v608_v63 }
 0x107   :  { %942 = vmatmul.bf16.gmra.mxu2 %v721_v3 }
 0x108   :  { %1111 = vmatmul.bf16.gmra.mxu3 %v722_v4  ;;  %v290_v6 = vpop.f32.mrf.mxu0 }
 0x109   :  { %v459_v7 = vpop.f32.mrf.mxu1  ;;  %v291_v8 = vadd.f32 %v290_v6, %v1703_v58  ;;  %v57_v6 = vld [vmem:[%s2214_s0 + $0x138] sm:$0xff] }
 0x10a   :  { %v460_v9 = vadd.f32 %v459_v7, %v1706_v59 }
 0x10b   :  { %1401 = vmatmul.msk.bf16.gmra.mxu0 %vm144_vm0, %v98_v5  ;;  %v611_v14 = vmax.f32 %v291_v8, 0.0 }
 0x10c   :  { %1433 = vmatmul.msk.bf16.gmra.mxu1 %vm144_vm0, %v98_v5  ;;  %v612_v16 = vmax.f32 %v460_v9, 0.0  ;;  %v56_v5 = vld [vmem:[%s2214_s0 + $0x130] sm:$0xff] }
 0x110   :  { %v292_v10 = vpop.f32.mrf.mxu0 }
 0x111   :  { %v293_v11 = vadd.f32 %v292_v10, %v1703_v58  ;;  %v461_v12 = vpop.f32.mrf.mxu1  ;;  %v101_v10 = vpack.c.bf16 %v57_v6, %v56_v5 }
 0x112   :  { %v462_v13 = vadd.f32 %v461_v12, %v1706_v59 }
 0x113   :  { %v613_v15 = vmax.f32 %v293_v11, 0.0 }
 0x114   :  { %v614_v17 = vmax.f32 %v462_v13, 0.0 }
 0x115   :  { %v723_v20 = vpack.c.bf16 %v613_v15, %v611_v14 }
 0x116   :  { %v724_v21 = vpack.c.bf16 %v614_v17, %v612_v16 }
 0x117   :  { %947 = vmatmul.bf16.gmra.mxu2 %v723_v20 }
 0x118   :  { %1116 = vmatmul.bf16.gmra.mxu3 %v724_v21  ;;  %v295_v23 = vpop.f32.mrf.mxu0 }
 0x119   :  { %v464_v24 = vpop.f32.mrf.mxu1  ;;  %v296_v29 = vadd.f32 %v295_v23, %v1703_v58 }
 0x11a   :  { %v908_v25 = vpop.f32.mrf.mxu2  ;;  %v465_v30 = vadd.f32 %v464_v24, %v1706_v59 }
 0x11b   :  { %v1077_v26 = vpop.f32.mrf.mxu3  ;;  %1402 = vmatmul.msk.bf16.gmra.mxu0 %vm144_vm0, %v99_v22  ;;  %v615_v36 = vmax.f32 %v296_v29, 0.0 }
 0x11c   :  { %v1078_v27 = vadd.f32 %v1077_v26, %v908_v25  ;;  %1434 = vmatmul.msk.bf16.gmra.mxu1 %vm144_vm0, %v99_v22  ;;  %v616_v39 = vmax.f32 %v465_v30, 0.0  ;;  %v58_v30 = vld [vmem:[%s2214_s0 + $0x140] sm:$0xff] }
 0x11e   :  { %v1237_v28 = vmax.f32 %v1078_v27, 0.0 }
 0x120   :  { %1301 = vst [vmem:[%s2217_s4] sm:$0xff] %v1237_v28  ;;  %v297_v31 = vpop.f32.mrf.mxu0 }
 0x121   :  { %v298_v32 = vadd.f32 %v297_v31, %v1703_v58  ;;  %v466_v33 = vpop.f32.mrf.mxu1  ;;  %v59_v31 = vld [vmem:[%s2214_s0 + $0x148] sm:$0xff] }
 0x122   :  { %v467_v34 = vadd.f32 %v466_v33, %v1706_v59  ;;  %v910_v35 = vpop.f32.mrf.mxu2 }
 0x123   :  { %v617_v37 = vmax.f32 %v298_v32, 0.0  ;;  %v1079_v38 = vpop.f32.mrf.mxu3 }
 0x124   :  { %v618_v40 = vmax.f32 %v467_v34, 0.0  ;;  %v1080_v41 = vadd.f32 %v1079_v38, %v910_v35  ;;  %v102_v35 = vpack.c.bf16 %v59_v31, %v58_v30 }
 0x125   :  { %v725_v44 = vpack.c.bf16 %v617_v37, %v615_v36 }
 0x126   :  { %v1238_v45 = vmax.f32 %v1080_v41, 0.0  ;;  %v726_v46 = vpack.c.bf16 %v618_v40, %v616_v39 }
 0x127   :  { %952 = vmatmul.bf16.gmra.mxu2 %v725_v44 }
 0x128   :  { %1302 = vst [vmem:[%s2217_s4 + $0x8] sm:$0xff] %v1238_v45  ;;  %1121 = vmatmul.bf16.gmra.mxu3 %v726_v46  ;;  %v300_v48 = vpop.f32.mrf.mxu0 }
 0x129   :  { %v469_v49 = vpop.f32.mrf.mxu1  ;;  %v301_v54 = vadd.f32 %v300_v48, %v1703_v58 }
 0x12a   :  { %v913_v50 = vpop.f32.mrf.mxu2  ;;  %v470_v55 = vadd.f32 %v469_v49, %v1706_v59 }
 0x12b   :  { %v1082_v51 = vpop.f32.mrf.mxu3  ;;  %1403 = vmatmul.msk.bf16.gmra.mxu0 %vm144_vm0, %v100_v47  ;;  %v619_v63 = vmax.f32 %v301_v54, 0.0 }
 0x12c   :  { %v1083_v52 = vadd.f32 %v1082_v51, %v913_v50  ;;  %1435 = vmatmul.msk.bf16.gmra.mxu1 %vm144_vm0, %v100_v47  ;;  %v620_v2 = vmax.f32 %v470_v55, 0.0  ;;  %v60_v55 = vld [vmem:[%s2214_s0 + $0x150] sm:$0xff] }
 0x12e   :  { %v1239_v53 = vmax.f32 %v1083_v52, 0.0 }
 0x130   :  { %1303 = vst [vmem:[%s2217_s4 + $0x10] sm:$0xff] %v1239_v53  ;;  %v302_v56 = vpop.f32.mrf.mxu0 }
 0x131   :  { %v303_v57 = vadd.f32 %v302_v56, %v1703_v58  ;;  %v471_v60 = vpop.f32.mrf.mxu1  ;;  %v61_v56 = vld [vmem:[%s2214_s0 + $0x158] sm:$0xff] }
 0x132   :  { %v472_v61 = vadd.f32 %v471_v60, %v1706_v59  ;;  %v915_v62 = vpop.f32.mrf.mxu2 }
 0x133   :  { %v621_v0 = vmax.f32 %v303_v57, 0.0  ;;  %v1084_v1 = vpop.f32.mrf.mxu3 }
 0x134   :  { %v622_v3 = vmax.f32 %v472_v61, 0.0  ;;  %v1085_v4 = vadd.f32 %v1084_v1, %v915_v62  ;;  %v103_v62 = vpack.c.bf16 %v61_v56, %v60_v55 }
 0x135   :  { %v727_v7 = vpack.c.bf16 %v621_v0, %v619_v63 }
 0x136   :  { %v1240_v8 = vmax.f32 %v1085_v4, 0.0  ;;  %v728_v9 = vpack.c.bf16 %v622_v3, %v620_v2 }
 0x137   :  { %957 = vmatmul.bf16.gmra.mxu2 %v727_v7 }
 0x138   :  { %1304 = vst [vmem:[%s2217_s4 + $0x18] sm:$0xff] %v1240_v8  ;;  %1126 = vmatmul.bf16.gmra.mxu3 %v728_v9  ;;  %v305_v11 = vpop.f32.mrf.mxu0 }
 0x139   :  { %v474_v12 = vpop.f32.mrf.mxu1  ;;  %v306_v17 = vadd.f32 %v305_v11, %v1703_v58 }
 0x13a   :  { %v918_v13 = vpop.f32.mrf.mxu2  ;;  %v475_v18 = vadd.f32 %v474_v12, %v1706_v59 }
 0x13b   :  { %v1087_v14 = vpop.f32.mrf.mxu3  ;;  %1404 = vmatmul.msk.bf16.gmra.mxu0 %vm144_vm0, %v101_v10  ;;  %v623_v24 = vmax.f32 %v306_v17, 0.0 }
 0x13c   :  { %v1088_v15 = vadd.f32 %v1087_v14, %v918_v13  ;;  %1436 = vmatmul.msk.bf16.gmra.mxu1 %vm144_vm0, %v101_v10  ;;  %v624_v27 = vmax.f32 %v475_v18, 0.0  ;;  %v62_v18 = vld [vmem:[%s2214_s0 + $0x160] sm:$0xff] }
 0x13e   :  { %v1241_v16 = vmax.f32 %v1088_v15, 0.0 }
 0x140   :  { %1305 = vst [vmem:[%s2217_s4 + $0x20] sm:$0xff] %v1241_v16  ;;  %v307_v19 = vpop.f32.mrf.mxu0 }
 0x141   :  { %v308_v20 = vadd.f32 %v307_v19, %v1703_v58  ;;  %v476_v21 = vpop.f32.mrf.mxu1  ;;  %v63_v19 = vld [vmem:[%s2214_s0 + $0x168] sm:$0xff] }
 0x142   :  { %v477_v22 = vadd.f32 %v476_v21, %v1706_v59  ;;  %v920_v23 = vpop.f32.mrf.mxu2 }
 0x143   :  { %v625_v25 = vmax.f32 %v308_v20, 0.0  ;;  %v1089_v26 = vpop.f32.mrf.mxu3 }
 0x144   :  { %v626_v28 = vmax.f32 %v477_v22, 0.0  ;;  %v1090_v29 = vadd.f32 %v1089_v26, %v920_v23  ;;  %v104_v23 = vpack.c.bf16 %v63_v19, %v62_v18 }
 0x145   :  { %v729_v32 = vpack.c.bf16 %v625_v25, %v623_v24 }
 0x146   :  { %v1242_v33 = vmax.f32 %v1090_v29, 0.0  ;;  %v730_v34 = vpack.c.bf16 %v626_v28, %v624_v27 }
 0x147   :  { %962 = vmatmul.bf16.gmra.mxu2 %v729_v32 }
 0x148   :  { %1306 = vst [vmem:[%s2217_s4 + $0x28] sm:$0xff] %v1242_v33  ;;  %1131 = vmatmul.bf16.gmra.mxu3 %v730_v34  ;;  %v310_v36 = vpop.f32.mrf.mxu0 }
 0x149   :  { %v479_v37 = vpop.f32.mrf.mxu1  ;;  %v311_v42 = vadd.f32 %v310_v36, %v1703_v58 }
 0x14a   :  { %v923_v38 = vpop.f32.mrf.mxu2  ;;  %v480_v43 = vadd.f32 %v479_v37, %v1706_v59 }
 0x14b   :  { %v1092_v39 = vpop.f32.mrf.mxu3  ;;  %1405 = vmatmul.msk.bf16.gmra.mxu0 %vm144_vm0, %v102_v35  ;;  %v627_v49 = vmax.f32 %v311_v42, 0.0 }
 0x14c   :  { %v1093_v40 = vadd.f32 %v1092_v39, %v923_v38  ;;  %1437 = vmatmul.msk.bf16.gmra.mxu1 %vm144_vm0, %v102_v35  ;;  %v628_v52 = vmax.f32 %v480_v43, 0.0  ;;  %v64_v43 = vld [vmem:[%s2214_s0 + $0x170] sm:$0xff] }
 0x14e   :  { %v1243_v41 = vmax.f32 %v1093_v40, 0.0 }
 0x150   :  { %1307 = vst [vmem:[%s2217_s4 + $0x30] sm:$0xff] %v1243_v41  ;;  %v312_v44 = vpop.f32.mrf.mxu0 }
 0x151   :  { %v313_v45 = vadd.f32 %v312_v44, %v1703_v58  ;;  %v481_v46 = vpop.f32.mrf.mxu1  ;;  %v65_v44 = vld [vmem:[%s2214_s0 + $0x178] sm:$0xff] }
 0x152   :  { %v482_v47 = vadd.f32 %v481_v46, %v1706_v59  ;;  %v925_v48 = vpop.f32.mrf.mxu2 }
 0x153   :  { %v629_v50 = vmax.f32 %v313_v45, 0.0  ;;  %v1094_v51 = vpop.f32.mrf.mxu3 }
 0x154   :  { %v630_v53 = vmax.f32 %v482_v47, 0.0  ;;  %v1095_v54 = vadd.f32 %v1094_v51, %v925_v48  ;;  %v105_v48 = vpack.c.bf16 %v65_v44, %v64_v43 }
 0x155   :  { %v731_v57 = vpack.c.bf16 %v629_v50, %v627_v49 }
 0x156   :  { %v1244_v60 = vmax.f32 %v1095_v54, 0.0  ;;  %v732_v61 = vpack.c.bf16 %v630_v53, %v628_v52 }
 0x157   :  { %967 = vmatmul.bf16.gmra.mxu2 %v731_v57 }
 0x158   :  { %1308 = vst [vmem:[%s2217_s4 + $0x38] sm:$0xff] %v1244_v60  ;;  %1136 = vmatmul.bf16.gmra.mxu3 %v732_v61  ;;  %v315_v63 = vpop.f32.mrf.mxu0 }
 0x159   :  { %v484_v0 = vpop.f32.mrf.mxu1  ;;  %v316_v5 = vadd.f32 %v315_v63, %v1703_v58 }
 0x15a   :  { %v928_v1 = vpop.f32.mrf.mxu2  ;;  %v485_v6 = vadd.f32 %v484_v0, %v1706_v59 }
 0x15b   :  { %v1097_v2 = vpop.f32.mrf.mxu3  ;;  %1406 = vmatmul.msk.bf16.gmra.mxu0 %vm144_vm0, %v103_v62  ;;  %v631_v12 = vmax.f32 %v316_v5, 0.0 }
 0x15c   :  { %v1098_v3 = vadd.f32 %v1097_v2, %v928_v1  ;;  %1438 = vmatmul.msk.bf16.gmra.mxu1 %vm144_vm0, %v103_v62  ;;  %v632_v15 = vmax.f32 %v485_v6, 0.0  ;;  %v66_v6 = vld [vmem:[%s2214_s0 + $0x180] sm:$0xff] }
 0x15e   :  { %v1245_v4 = vmax.f32 %v1098_v3, 0.0 }
 0x160   :  { %1309 = vst [vmem:[%s2217_s4 + $0x40] sm:$0xff] %v1245_v4  ;;  %v317_v7 = vpop.f32.mrf.mxu0 }
 0x161   :  { %v318_v8 = vadd.f32 %v317_v7, %v1703_v58  ;;  %v486_v9 = vpop.f32.mrf.mxu1  ;;  %v67_v7 = vld [vmem:[%s2214_s0 + $0x188] sm:$0xff] }
 0x162   :  { %v487_v10 = vadd.f32 %v486_v9, %v1706_v59  ;;  %v930_v11 = vpop.f32.mrf.mxu2 }
 0x163   :  { %v633_v13 = vmax.f32 %v318_v8, 0.0  ;;  %v1099_v14 = vpop.f32.mrf.mxu3 }
 0x164   :  { %v634_v16 = vmax.f32 %v487_v10, 0.0  ;;  %v1100_v17 = vadd.f32 %v1099_v14, %v930_v11  ;;  %v106_v11 = vpack.c.bf16 %v67_v7, %v66_v6 }
 0x165   :  { %v733_v20 = vpack.c.bf16 %v633_v13, %v631_v12 }
 0x166   :  { %v1246_v21 = vmax.f32 %v1100_v17, 0.0  ;;  %v734_v22 = vpack.c.bf16 %v634_v16, %v632_v15 }
 0x167   :  { %972 = vmatmul.bf16.gmra.mxu2 %v733_v20 }
 0x168   :  { %1310 = vst [vmem:[%s2217_s4 + $0x48] sm:$0xff] %v1246_v21  ;;  %1141 = vmatmul.bf16.gmra.mxu3 %v734_v22  ;;  %v320_v24 = vpop.f32.mrf.mxu0 }
 0x169   :  { %v489_v25 = vpop.f32.mrf.mxu1  ;;  %v321_v30 = vadd.f32 %v320_v24, %v1703_v58 }
 0x16a   :  { %v933_v26 = vpop.f32.mrf.mxu2  ;;  %v490_v31 = vadd.f32 %v489_v25, %v1706_v59 }
 0x16b   :  { %v1102_v27 = vpop.f32.mrf.mxu3  ;;  %1407 = vmatmul.msk.bf16.gmra.mxu0 %vm144_vm0, %v104_v23  ;;  %v635_v37 = vmax.f32 %v321_v30, 0.0 }
 0x16c   :  { %v1103_v28 = vadd.f32 %v1102_v27, %v933_v26  ;;  %1439 = vmatmul.msk.bf16.gmra.mxu1 %vm144_vm0, %v104_v23  ;;  %v636_v40 = vmax.f32 %v490_v31, 0.0  ;;  %v68_v31 = vld [vmem:[%s2214_s0 + $0x190] sm:$0xff] }
 0x16e   :  { %v1247_v29 = vmax.f32 %v1103_v28, 0.0 }
 0x170   :  { %1311 = vst [vmem:[%s2217_s4 + $0x50] sm:$0xff] %v1247_v29  ;;  %v322_v32 = vpop.f32.mrf.mxu0 }
 0x171   :  { %v323_v33 = vadd.f32 %v322_v32, %v1703_v58  ;;  %v491_v34 = vpop.f32.mrf.mxu1  ;;  %v69_v32 = vld [vmem:[%s2214_s0 + $0x198] sm:$0xff] }
 0x172   :  { %v492_v35 = vadd.f32 %v491_v34, %v1706_v59  ;;  %v935_v36 = vpop.f32.mrf.mxu2 }
 0x173   :  { %v637_v38 = vmax.f32 %v323_v33, 0.0  ;;  %v1104_v39 = vpop.f32.mrf.mxu3 }
 0x174   :  { %v638_v41 = vmax.f32 %v492_v35, 0.0  ;;  %v1105_v42 = vadd.f32 %v1104_v39, %v935_v36  ;;  %v107_v36 = vpack.c.bf16 %v69_v32, %v68_v31 }
 0x175   :  { %v735_v45 = vpack.c.bf16 %v637_v38, %v635_v37 }
 0x176   :  { %v1248_v46 = vmax.f32 %v1105_v42, 0.0  ;;  %v736_v47 = vpack.c.bf16 %v638_v41, %v636_v40 }
 0x177   :  { %977 = vmatmul.bf16.gmra.mxu2 %v735_v45 }
 0x178   :  { %1312 = vst [vmem:[%s2217_s4 + $0x58] sm:$0xff] %v1248_v46  ;;  %1146 = vmatmul.bf16.gmra.mxu3 %v736_v47  ;;  %v325_v49 = vpop.f32.mrf.mxu0 }
 0x179   :  { %v494_v50 = vpop.f32.mrf.mxu1  ;;  %v326_v55 = vadd.f32 %v325_v49, %v1703_v58 }
 0x17a   :  { %v938_v51 = vpop.f32.mrf.mxu2  ;;  %v495_v56 = vadd.f32 %v494_v50, %v1706_v59 }
 0x17b   :  { %v1107_v52 = vpop.f32.mrf.mxu3  ;;  %1408 = vmatmul.msk.bf16.gmra.mxu0 %vm144_vm0, %v105_v48  ;;  %v639_v0 = vmax.f32 %v326_v55, 0.0 }
 0x17c   :  { %v1108_v53 = vadd.f32 %v1107_v52, %v938_v51  ;;  %1440 = vmatmul.msk.bf16.gmra.mxu1 %vm144_vm0, %v105_v48  ;;  %v640_v3 = vmax.f32 %v495_v56, 0.0  ;;  %v70_v56 = vld [vmem:[%s2214_s0 + $0x1a0] sm:$0xff] }
 0x17e   :  { %v1249_v54 = vmax.f32 %v1108_v53, 0.0 }
 0x180   :  { %1313 = vst [vmem:[%s2217_s4 + $0x60] sm:$0xff] %v1249_v54  ;;  %v327_v57 = vpop.f32.mrf.mxu0 }
 0x181   :  { %v328_v60 = vadd.f32 %v327_v57, %v1703_v58  ;;  %v496_v61 = vpop.f32.mrf.mxu1  ;;  %v71_v57 = vld [vmem:[%s2214_s0 + $0x1a8] sm:$0xff] }
 0x182   :  { %v497_v62 = vadd.f32 %v496_v61, %v1706_v59  ;;  %v940_v63 = vpop.f32.mrf.mxu2 }
 0x183   :  { %v641_v1 = vmax.f32 %v328_v60, 0.0  ;;  %v1109_v2 = vpop.f32.mrf.mxu3 }
 0x184   :  { %v642_v4 = vmax.f32 %v497_v62, 0.0  ;;  %v1110_v5 = vadd.f32 %v1109_v2, %v940_v63  ;;  %v108_v63 = vpack.c.bf16 %v71_v57, %v70_v56 }
 0x185   :  { %v737_v8 = vpack.c.bf16 %v641_v1, %v639_v0 }
 0x186   :  { %v1250_v9 = vmax.f32 %v1110_v5, 0.0  ;;  %v738_v10 = vpack.c.bf16 %v642_v4, %v640_v3 }
 0x187   :  { %982 = vmatmul.bf16.gmra.mxu2 %v737_v8 }
 0x188   :  { %1314 = vst [vmem:[%s2217_s4 + $0x68] sm:$0xff] %v1250_v9  ;;  %1151 = vmatmul.bf16.gmra.mxu3 %v738_v10  ;;  %v330_v12 = vpop.f32.mrf.mxu0 }
 0x189   :  { %v499_v13 = vpop.f32.mrf.mxu1  ;;  %v331_v18 = vadd.f32 %v330_v12, %v1703_v58 }
 0x18a   :  { %v943_v14 = vpop.f32.mrf.mxu2  ;;  %v500_v19 = vadd.f32 %v499_v13, %v1706_v59 }
 0x18b   :  { %v1112_v15 = vpop.f32.mrf.mxu3  ;;  %1409 = vmatmul.msk.bf16.gmra.mxu0 %vm144_vm0, %v106_v11  ;;  %v643_v25 = vmax.f32 %v331_v18, 0.0 }
 0x18c   :  { %v1113_v16 = vadd.f32 %v1112_v15, %v943_v14  ;;  %1441 = vmatmul.msk.bf16.gmra.mxu1 %vm144_vm0, %v106_v11  ;;  %v644_v28 = vmax.f32 %v500_v19, 0.0  ;;  %v72_v19 = vld [vmem:[%s2214_s0 + $0x1b0] sm:$0xff] }
 0x18e   :  { %v1251_v17 = vmax.f32 %v1113_v16, 0.0 }
 0x190   :  { %1315 = vst [vmem:[%s2217_s4 + $0x70] sm:$0xff] %v1251_v17  ;;  %v332_v20 = vpop.f32.mrf.mxu0 }
 0x191   :  { %v333_v21 = vadd.f32 %v332_v20, %v1703_v58  ;;  %v501_v22 = vpop.f32.mrf.mxu1  ;;  %v73_v20 = vld [vmem:[%s2214_s0 + $0x1b8] sm:$0xff] }
 0x192   :  { %v502_v23 = vadd.f32 %v501_v22, %v1706_v59  ;;  %v945_v24 = vpop.f32.mrf.mxu2 }
 0x193   :  { %v645_v26 = vmax.f32 %v333_v21, 0.0  ;;  %v1114_v27 = vpop.f32.mrf.mxu3 }
 0x194   :  { %v646_v29 = vmax.f32 %v502_v23, 0.0  ;;  %v1115_v30 = vadd.f32 %v1114_v27, %v945_v24  ;;  %v109_v24 = vpack.c.bf16 %v73_v20, %v72_v19 }
 0x195   :  { %v739_v33 = vpack.c.bf16 %v645_v26, %v643_v25 }
 0x196   :  { %v1252_v34 = vmax.f32 %v1115_v30, 0.0  ;;  %v740_v35 = vpack.c.bf16 %v646_v29, %v644_v28 }
 0x197   :  { %987 = vmatmul.bf16.gmra.mxu2 %v739_v33 }
 0x198   :  { %1316 = vst [vmem:[%s2217_s4 + $0x78] sm:$0xff] %v1252_v34  ;;  %1156 = vmatmul.bf16.gmra.mxu3 %v740_v35  ;;  %v335_v37 = vpop.f32.mrf.mxu0 }
 0x199   :  { %v504_v38 = vpop.f32.mrf.mxu1  ;;  %v336_v43 = vadd.f32 %v335_v37, %v1703_v58 }
 0x19a   :  { %v948_v39 = vpop.f32.mrf.mxu2  ;;  %v505_v44 = vadd.f32 %v504_v38, %v1706_v59 }
 0x19b   :  { %v1117_v40 = vpop.f32.mrf.mxu3  ;;  %1410 = vmatmul.msk.bf16.gmra.mxu0 %vm144_vm0, %v107_v36  ;;  %v647_v50 = vmax.f32 %v336_v43, 0.0 }
 0x19c   :  { %v1118_v41 = vadd.f32 %v1117_v40, %v948_v39  ;;  %1442 = vmatmul.msk.bf16.gmra.mxu1 %vm144_vm0, %v107_v36  ;;  %v648_v53 = vmax.f32 %v505_v44, 0.0  ;;  %v74_v44 = vld [vmem:[%s2214_s0 + $0x1c0] sm:$0xff] }
 0x19e   :  { %v1253_v42 = vmax.f32 %v1118_v41, 0.0 }
 0x1a0   :  { %1317 = vst [vmem:[%s2217_s4 + $0x80] sm:$0xff] %v1253_v42  ;;  %v337_v45 = vpop.f32.mrf.mxu0 }
 0x1a1   :  { %v338_v46 = vadd.f32 %v337_v45, %v1703_v58  ;;  %v506_v47 = vpop.f32.mrf.mxu1  ;;  %v75_v45 = vld [vmem:[%s2214_s0 + $0x1c8] sm:$0xff] }
 0x1a2   :  { %v507_v48 = vadd.f32 %v506_v47, %v1706_v59  ;;  %v950_v49 = vpop.f32.mrf.mxu2 }
 0x1a3   :  { %v649_v51 = vmax.f32 %v338_v46, 0.0  ;;  %v1119_v52 = vpop.f32.mrf.mxu3 }
 0x1a4   :  { %v650_v54 = vmax.f32 %v507_v48, 0.0  ;;  %v1120_v55 = vadd.f32 %v1119_v52, %v950_v49  ;;  %v110_v49 = vpack.c.bf16 %v75_v45, %v74_v44 }
 0x1a5   :  { %v741_v60 = vpack.c.bf16 %v649_v51, %v647_v50 }
 0x1a6   :  { %v1254_v61 = vmax.f32 %v1120_v55, 0.0  ;;  %v742_v62 = vpack.c.bf16 %v650_v54, %v648_v53 }
 0x1a7   :  { %992 = vmatmul.bf16.gmra.mxu2 %v741_v60 }
 0x1a8   :  { %1318 = vst [vmem:[%s2217_s4 + $0x88] sm:$0xff] %v1254_v61  ;;  %1161 = vmatmul.bf16.gmra.mxu3 %v742_v62  ;;  %v340_v0 = vpop.f32.mrf.mxu0 }
 0x1a9   :  { %v509_v1 = vpop.f32.mrf.mxu1  ;;  %v341_v6 = vadd.f32 %v340_v0, %v1703_v58 }
 0x1aa   :  { %v953_v2 = vpop.f32.mrf.mxu2  ;;  %v510_v7 = vadd.f32 %v509_v1, %v1706_v59 }
 0x1ab   :  { %v1122_v3 = vpop.f32.mrf.mxu3  ;;  %1411 = vmatmul.msk.bf16.gmra.mxu0 %vm144_vm0, %v108_v63  ;;  %v651_v13 = vmax.f32 %v341_v6, 0.0 }
 0x1ac   :  { %v1123_v4 = vadd.f32 %v1122_v3, %v953_v2  ;;  %1443 = vmatmul.msk.bf16.gmra.mxu1 %vm144_vm0, %v108_v63  ;;  %v652_v16 = vmax.f32 %v510_v7, 0.0  ;;  %v76_v7 = vld [vmem:[%s2214_s0 + $0x1d0] sm:$0xff] }
 0x1ae   :  { %v1255_v5 = vmax.f32 %v1123_v4, 0.0 }
 0x1b0   :  { %1319 = vst [vmem:[%s2217_s4 + $0x90] sm:$0xff] %v1255_v5  ;;  %v342_v8 = vpop.f32.mrf.mxu0 }
 0x1b1   :  { %v343_v9 = vadd.f32 %v342_v8, %v1703_v58  ;;  %v511_v10 = vpop.f32.mrf.mxu1  ;;  %v77_v8 = vld [vmem:[%s2214_s0 + $0x1d8] sm:$0xff] }
 0x1b2   :  { %v512_v11 = vadd.f32 %v511_v10, %v1706_v59  ;;  %v955_v12 = vpop.f32.mrf.mxu2 }
 0x1b3   :  { %v653_v14 = vmax.f32 %v343_v9, 0.0  ;;  %v1124_v15 = vpop.f32.mrf.mxu3 }
 0x1b4   :  { %v654_v17 = vmax.f32 %v512_v11, 0.0  ;;  %v1125_v18 = vadd.f32 %v1124_v15, %v955_v12  ;;  %v111_v12 = vpack.c.bf16 %v77_v8, %v76_v7 }
 0x1b5   :  { %v743_v21 = vpack.c.bf16 %v653_v14, %v651_v13 }
 0x1b6   :  { %v1256_v22 = vmax.f32 %v1125_v18, 0.0  ;;  %v744_v23 = vpack.c.bf16 %v654_v17, %v652_v16 }
 0x1b7   :  { %997 = vmatmul.bf16.gmra.mxu2 %v743_v21 }
 0x1b8   :  { %1320 = vst [vmem:[%s2217_s4 + $0x98] sm:$0xff] %v1256_v22  ;;  %1166 = vmatmul.bf16.gmra.mxu3 %v744_v23  ;;  %v345_v25 = vpop.f32.mrf.mxu0 }
 0x1b9   :  { %v514_v26 = vpop.f32.mrf.mxu1  ;;  %v346_v31 = vadd.f32 %v345_v25, %v1703_v58 }
 0x1ba   :  { %v958_v27 = vpop.f32.mrf.mxu2  ;;  %v515_v32 = vadd.f32 %v514_v26, %v1706_v59 }
 0x1bb   :  { %v1127_v28 = vpop.f32.mrf.mxu3  ;;  %1412 = vmatmul.msk.bf16.gmra.mxu0 %vm144_vm0, %v109_v24  ;;  %v655_v38 = vmax.f32 %v346_v31, 0.0 }
 0x1bc   :  { %v1128_v29 = vadd.f32 %v1127_v28, %v958_v27  ;;  %1444 = vmatmul.msk.bf16.gmra.mxu1 %vm144_vm0, %v109_v24  ;;  %v656_v41 = vmax.f32 %v515_v32, 0.0  ;;  %v78_v32 = vld [vmem:[%s2214_s0 + $0x1e0] sm:$0xff] }
 0x1be   :  { %v1257_v30 = vmax.f32 %v1128_v29, 0.0 }
 0x1c0   :  { %1321 = vst [vmem:[%s2217_s4 + $0xa0] sm:$0xff] %v1257_v30  ;;  %v347_v33 = vpop.f32.mrf.mxu0 }
 0x1c1   :  { %v348_v34 = vadd.f32 %v347_v33, %v1703_v58  ;;  %v516_v35 = vpop.f32.mrf.mxu1  ;;  %v79_v33 = vld [vmem:[%s2214_s0 + $0x1e8] sm:$0xff] }
 0x1c2   :  { %v517_v36 = vadd.f32 %v516_v35, %v1706_v59  ;;  %v960_v37 = vpop.f32.mrf.mxu2 }
 0x1c3   :  { %v657_v39 = vmax.f32 %v348_v34, 0.0  ;;  %v1129_v40 = vpop.f32.mrf.mxu3 }
 0x1c4   :  { %v658_v42 = vmax.f32 %v517_v36, 0.0  ;;  %v1130_v43 = vadd.f32 %v1129_v40, %v960_v37  ;;  %v112_v37 = vpack.c.bf16 %v79_v33, %v78_v32 }
 0x1c5   :  { %v745_v46 = vpack.c.bf16 %v657_v39, %v655_v38 }
 0x1c6   :  { %v1258_v47 = vmax.f32 %v1130_v43, 0.0  ;;  %v746_v48 = vpack.c.bf16 %v658_v42, %v656_v41 }
 0x1c7   :  { %1002 = vmatmul.bf16.gmra.mxu2 %v745_v46 }
 0x1c8   :  { %1322 = vst [vmem:[%s2217_s4 + $0xa8] sm:$0xff] %v1258_v47  ;;  %1171 = vmatmul.bf16.gmra.mxu3 %v746_v48  ;;  %v350_v50 = vpop.f32.mrf.mxu0 }
 0x1c9   :  { %v519_v51 = vpop.f32.mrf.mxu1  ;;  %v351_v56 = vadd.f32 %v350_v50, %v1703_v58 }
 0x1ca   :  { %v963_v52 = vpop.f32.mrf.mxu2  ;;  %v520_v57 = vadd.f32 %v519_v51, %v1706_v59 }
 0x1cb   :  { %v1132_v53 = vpop.f32.mrf.mxu3  ;;  %1413 = vmatmul.msk.bf16.gmra.mxu0 %vm144_vm0, %v110_v49  ;;  %v659_v1 = vmax.f32 %v351_v56, 0.0 }
 0x1cc   :  { %v1133_v54 = vadd.f32 %v1132_v53, %v963_v52  ;;  %1445 = vmatmul.msk.bf16.gmra.mxu1 %vm144_vm0, %v110_v49  ;;  %v660_v4 = vmax.f32 %v520_v57, 0.0  ;;  %v80_v57 = vld [vmem:[%s2214_s0 + $0x1f0] sm:$0xff] }
 0x1ce   :  { %v1259_v55 = vmax.f32 %v1133_v54, 0.0 }
 0x1d0   :  { %1323 = vst [vmem:[%s2217_s4 + $0xb0] sm:$0xff] %v1259_v55  ;;  %v352_v60 = vpop.f32.mrf.mxu0 }
 0x1d1   :  { %v353_v61 = vadd.f32 %v352_v60, %v1703_v58  ;;  %v521_v62 = vpop.f32.mrf.mxu1  ;;  %v81_v60 = vld [vmem:[%s2214_s0 + $0x1f8] sm:$0xff] }
 0x1d2   :  { %v522_v63 = vadd.f32 %v521_v62, %v1706_v59  ;;  %v965_v0 = vpop.f32.mrf.mxu2 }
 0x1d3   :  { %v661_v2 = vmax.f32 %v353_v61, 0.0  ;;  %v1134_v3 = vpop.f32.mrf.mxu3 }
 0x1d4   :  { %v662_v5 = vmax.f32 %v522_v63, 0.0  ;;  %v1135_v6 = vadd.f32 %v1134_v3, %v965_v0  ;;  %v113_v0 = vpack.c.bf16 %v81_v60, %v80_v57 }
 0x1d5   :  { %v747_v9 = vpack.c.bf16 %v661_v2, %v659_v1 }
 0x1d6   :  { %v748_v10 = vpack.c.bf16 %v662_v5, %v660_v4  ;;  %v1260_v11 = vmax.f32 %v1135_v6, 0.0 }
 0x1d7   :  { %1007 = vmatmul.bf16.gmra.mxu2 %v747_v9 }
 0x1d8   :  { %1324 = vst [vmem:[%s2217_s4 + $0xb8] sm:$0xff] %v1260_v11  ;;  %1176 = vmatmul.bf16.gmra.mxu3 %v748_v10  ;;  %v355_v13 = vpop.f32.mrf.mxu0 }
 0x1d9   :  { %v524_v14 = vpop.f32.mrf.mxu1  ;;  %v356_v19 = vadd.f32 %v355_v13, %v1703_v58 }
 0x1da   :  { %v968_v15 = vpop.f32.mrf.mxu2  ;;  %v525_v20 = vadd.f32 %v524_v14, %v1706_v59 }
 0x1db   :  { %v1137_v16 = vpop.f32.mrf.mxu3  ;;  %1414 = vmatmul.msk.bf16.gmra.mxu0 %vm144_vm0, %v111_v12  ;;  %v663_v26 = vmax.f32 %v356_v19, 0.0 }
 0x1dc   :  { %v1138_v17 = vadd.f32 %v1137_v16, %v968_v15  ;;  %1446 = vmatmul.msk.bf16.gmra.mxu1 %vm144_vm0, %v111_v12  ;;  %v664_v29 = vmax.f32 %v525_v20, 0.0 }
 0x1de   :  { %v1261_v18 = vmax.f32 %v1138_v17, 0.0 }
 0x1e0   :  { %1325 = vst [vmem:[%s2217_s4 + $0xc0] sm:$0xff] %v1261_v18  ;;  %v357_v21 = vpop.f32.mrf.mxu0 }
 0x1e1   :  { %v358_v22 = vadd.f32 %v357_v21, %v1703_v58  ;;  %v526_v23 = vpop.f32.mrf.mxu1 }
 0x1e2   :  { %v527_v24 = vadd.f32 %v526_v23, %v1706_v59  ;;  %v970_v25 = vpop.f32.mrf.mxu2 }
 0x1e3   :  { %v665_v27 = vmax.f32 %v358_v22, 0.0  ;;  %v1139_v28 = vpop.f32.mrf.mxu3 }
 0x1e4   :  { %v666_v30 = vmax.f32 %v527_v24, 0.0  ;;  %v1140_v31 = vadd.f32 %v1139_v28, %v970_v25 }
 0x1e5   :  { %v749_v34 = vpack.c.bf16 %v665_v27, %v663_v26 }
 0x1e6   :  { %v750_v35 = vpack.c.bf16 %v666_v30, %v664_v29  ;;  %v1262_v36 = vmax.f32 %v1140_v31, 0.0 }
 0x1e7   :  { %1012 = vmatmul.bf16.gmra.mxu2 %v749_v34 }
 0x1e8   :  { %1326 = vst [vmem:[%s2217_s4 + $0xc8] sm:$0xff] %v1262_v36  ;;  %1181 = vmatmul.bf16.gmra.mxu3 %v750_v35  ;;  %v360_v38 = vpop.f32.mrf.mxu0 }
 0x1e9   :  { %v529_v39 = vpop.f32.mrf.mxu1  ;;  %v361_v44 = vadd.f32 %v360_v38, %v1703_v58 }
 0x1ea   :  { %v973_v40 = vpop.f32.mrf.mxu2  ;;  %v530_v45 = vadd.f32 %v529_v39, %v1706_v59 }
 0x1eb   :  { %v1142_v41 = vpop.f32.mrf.mxu3  ;;  %1415 = vmatmul.msk.bf16.gmra.mxu0 %vm144_vm0, %v112_v37  ;;  %v667_v51 = vmax.f32 %v361_v44, 0.0 }
 0x1ec   :  { %v1143_v42 = vadd.f32 %v1142_v41, %v973_v40  ;;  %1447 = vmatmul.msk.bf16.gmra.mxu1 %vm144_vm0, %v112_v37  ;;  %v668_v54 = vmax.f32 %v530_v45, 0.0 }
 0x1ee   :  { %v1263_v43 = vmax.f32 %v1143_v42, 0.0 }
 0x1f0   :  { %1327 = vst [vmem:[%s2217_s4 + $0xd0] sm:$0xff] %v1263_v43  ;;  %v362_v46 = vpop.f32.mrf.mxu0 }
 0x1f1   :  { %v363_v47 = vadd.f32 %v362_v46, %v1703_v58  ;;  %v531_v48 = vpop.f32.mrf.mxu1 }
 0x1f2   :  { %v532_v49 = vadd.f32 %v531_v48, %v1706_v59  ;;  %v975_v50 = vpop.f32.mrf.mxu2 }
 0x1f3   :  { %v669_v52 = vmax.f32 %v363_v47, 0.0  ;;  %v1144_v53 = vpop.f32.mrf.mxu3 }
 0x1f4   :  { %v670_v55 = vmax.f32 %v532_v49, 0.0  ;;  %v1145_v56 = vadd.f32 %v1144_v53, %v975_v50 }
 0x1f5   :  { %v751_v61 = vpack.c.bf16 %v669_v52, %v667_v51 }
 0x1f6   :  { %v752_v62 = vpack.c.bf16 %v670_v55, %v668_v54  ;;  %v1264_v63 = vmax.f32 %v1145_v56, 0.0 }
 0x1f7   :  { %1017 = vmatmul.bf16.gmra.mxu2 %v751_v61 }
 0x1f8   :  { %1328 = vst [vmem:[%s2217_s4 + $0xd8] sm:$0xff] %v1264_v63  ;;  %1186 = vmatmul.bf16.gmra.mxu3 %v752_v62  ;;  %v365_v1 = vpop.f32.mrf.mxu0 }
 0x1f9   :  { %v534_v2 = vpop.f32.mrf.mxu1  ;;  %v366_v7 = vadd.f32 %v365_v1, %v1703_v58 }
 0x1fa   :  { %v978_v3 = vpop.f32.mrf.mxu2  ;;  %v535_v8 = vadd.f32 %v534_v2, %v1706_v59 }
 0x1fb   :  { %v1147_v4 = vpop.f32.mrf.mxu3  ;;  %1416 = vmatmul.msk.bf16.gmra.mxu0 %vm144_vm0, %v113_v0  ;;  %v671_v14 = vmax.f32 %v366_v7, 0.0 }
 0x1fc   :  { %v1148_v5 = vadd.f32 %v1147_v4, %v978_v3  ;;  %1448 = vmatmul.msk.bf16.gmra.mxu1 %vm144_vm0, %v113_v0  ;;  %v672_v17 = vmax.f32 %v535_v8, 0.0 }
 0x1fe   :  { %v1265_v6 = vmax.f32 %v1148_v5, 0.0 }
 0x200   :  { %1329 = vst [vmem:[%s2217_s4 + $0xe0] sm:$0xff] %v1265_v6  ;;  %v367_v9 = vpop.f32.mrf.mxu0 }
 0x201   :  { %v368_v10 = vadd.f32 %v367_v9, %v1703_v58  ;;  %v536_v11 = vpop.f32.mrf.mxu1 }
 0x202   :  { %v537_v12 = vadd.f32 %v536_v11, %v1706_v59  ;;  %v980_v13 = vpop.f32.mrf.mxu2 }
 0x203   :  { %v673_v15 = vmax.f32 %v368_v10, 0.0  ;;  %v1149_v16 = vpop.f32.mrf.mxu3 }
 0x204   :  { %v674_v18 = vmax.f32 %v537_v12, 0.0  ;;  %v1150_v19 = vadd.f32 %v1149_v16, %v980_v13 }
 0x205   :  { %v753_v20 = vpack.c.bf16 %v673_v15, %v671_v14 }
 0x206   :  { %v754_v21 = vpack.c.bf16 %v674_v18, %v672_v17  ;;  %v1266_v22 = vmax.f32 %v1150_v19, 0.0 }
 0x207   :  { %1022 = vmatmul.bf16.gmra.mxu2 %v753_v20 }
 0x208   :  { %1330 = vst [vmem:[%s2217_s4 + $0xe8] sm:$0xff] %v1266_v22  ;;  %1191 = vmatmul.bf16.gmra.mxu3 %v754_v21  ;;  %v370_v23 = vpop.f32.mrf.mxu0 }
 0x209   :  { %v539_v24 = vpop.f32.mrf.mxu1  ;;  %v371_v29 = vadd.f32 %v370_v23, %v1703_v58 }
 0x20a   :  { %v983_v25 = vpop.f32.mrf.mxu2  ;;  %v540_v30 = vadd.f32 %v539_v24, %v1706_v59 }
 0x20b   :  { %v1152_v26 = vpop.f32.mrf.mxu3  ;;  %v675_v36 = vmax.f32 %v371_v29, 0.0 }
 0x20c   :  { %v1153_v27 = vadd.f32 %v1152_v26, %v983_v25  ;;  %v676_v39 = vmax.f32 %v540_v30, 0.0 }
 0x20e   :  { %v1267_v28 = vmax.f32 %v1153_v27, 0.0 }
 0x210   :  { %1331 = vst [vmem:[%s2217_s4 + $0xf0] sm:$0xff] %v1267_v28  ;;  %v372_v31 = vpop.f32.mrf.mxu0 }
 0x211   :  { %v373_v32 = vadd.f32 %v372_v31, %v1703_v58  ;;  %v541_v33 = vpop.f32.mrf.mxu1 }
 0x212   :  { %v542_v34 = vadd.f32 %v541_v33, %v1706_v59  ;;  %v985_v35 = vpop.f32.mrf.mxu2 }
 0x213   :  { %v677_v37 = vmax.f32 %v373_v32, 0.0  ;;  %v1154_v38 = vpop.f32.mrf.mxu3 }
 0x214   :  { %v678_v40 = vmax.f32 %v542_v34, 0.0  ;;  %v1155_v41 = vadd.f32 %v1154_v38, %v985_v35 }
 0x215   :  { %v755_v42 = vpack.c.bf16 %v677_v37, %v675_v36 }
 0x216   :  { %v756_v43 = vpack.c.bf16 %v678_v40, %v676_v39  ;;  %v1268_v44 = vmax.f32 %v1155_v41, 0.0 }
 0x217   :  { %1027 = vmatmul.bf16.gmra.mxu2 %v755_v42 }
 0x218   :  { %1332 = vst [vmem:[%s2217_s4 + $0xf8] sm:$0xff] %v1268_v44  ;;  %1196 = vmatmul.bf16.gmra.mxu3 %v756_v43  ;;  %v375_v45 = vpop.f32.mrf.mxu0 }
 0x219   :  { %v544_v46 = vpop.f32.mrf.mxu1  ;;  %v376_v51 = vadd.f32 %v375_v45, %v1703_v58 }
 0x21a   :  { %v988_v47 = vpop.f32.mrf.mxu2  ;;  %v545_v52 = vadd.f32 %v544_v46, %v1706_v59 }
 0x21b   :  { %v1157_v48 = vpop.f32.mrf.mxu3  ;;  %v679_v60 = vmax.f32 %v376_v51, 0.0 }
 0x21c   :  { %v1158_v49 = vadd.f32 %v1157_v48, %v988_v47  ;;  %v680_v63 = vmax.f32 %v545_v52, 0.0 }
 0x21e   :  { %v1269_v50 = vmax.f32 %v1158_v49, 0.0 }
 0x220   :  { %1333 = vst [vmem:[%s2217_s4 + $0x100] sm:$0xff] %v1269_v50  ;;  %v377_v53 = vpop.f32.mrf.mxu0 }
 0x221   :  { %v378_v54 = vadd.f32 %v377_v53, %v1703_v58  ;;  %v546_v55 = vpop.f32.mrf.mxu1 }
 0x222   :  { %v547_v56 = vadd.f32 %v546_v55, %v1706_v59  ;;  %v990_v57 = vpop.f32.mrf.mxu2 }
 0x223   :  { %v681_v61 = vmax.f32 %v378_v54, 0.0  ;;  %v1159_v62 = vpop.f32.mrf.mxu3 }
 0x224   :  { %v682_v0 = vmax.f32 %v547_v56, 0.0  ;;  %v1160_v1 = vadd.f32 %v1159_v62, %v990_v57 }
 0x225   :  { %v757_v2 = vpack.c.bf16 %v681_v61, %v679_v60 }
 0x226   :  { %v758_v3 = vpack.c.bf16 %v682_v0, %v680_v63  ;;  %v1270_v4 = vmax.f32 %v1160_v1, 0.0 }
 0x227   :  { %1032 = vmatmul.bf16.gmra.mxu2 %v757_v2 }
 0x228   :  { %1334 = vst [vmem:[%s2217_s4 + $0x108] sm:$0xff] %v1270_v4  ;;  %1201 = vmatmul.bf16.gmra.mxu3 %v758_v3  ;;  %v380_v5 = vpop.f32.mrf.mxu0 }
 0x229   :  { %v549_v6 = vpop.f32.mrf.mxu1  ;;  %v381_v11 = vadd.f32 %v380_v5, %v1703_v58 }
 0x22a   :  { %v993_v7 = vpop.f32.mrf.mxu2  ;;  %v550_v12 = vadd.f32 %v549_v6, %v1706_v59 }
 0x22b   :  { %v1162_v8 = vpop.f32.mrf.mxu3  ;;  %v683_v18 = vmax.f32 %v381_v11, 0.0 }
 0x22c   :  { %v1163_v9 = vadd.f32 %v1162_v8, %v993_v7  ;;  %v684_v21 = vmax.f32 %v550_v12, 0.0 }
 0x22e   :  { %v1271_v10 = vmax.f32 %v1163_v9, 0.0 }
 0x230   :  { %1335 = vst [vmem:[%s2217_s4 + $0x110] sm:$0xff] %v1271_v10  ;;  %v382_v13 = vpop.f32.mrf.mxu0 }
 0x231   :  { %v383_v14 = vadd.f32 %v382_v13, %v1703_v58  ;;  %v551_v15 = vpop.f32.mrf.mxu1 }
 0x232   :  { %v552_v16 = vadd.f32 %v551_v15, %v1706_v59  ;;  %v995_v17 = vpop.f32.mrf.mxu2 }
 0x233   :  { %v685_v19 = vmax.f32 %v383_v14, 0.0  ;;  %v1164_v20 = vpop.f32.mrf.mxu3 }
 0x234   :  { %v686_v22 = vmax.f32 %v552_v16, 0.0  ;;  %v1165_v23 = vadd.f32 %v1164_v20, %v995_v17 }
 0x235   :  { %v759_v24 = vpack.c.bf16 %v685_v19, %v683_v18 }
 0x236   :  { %v760_v25 = vpack.c.bf16 %v686_v22, %v684_v21  ;;  %v1272_v26 = vmax.f32 %v1165_v23, 0.0 }
 0x237   :  { %1037 = vmatmul.bf16.gmra.mxu2 %v759_v24 }
 0x238   :  { %1336 = vst [vmem:[%s2217_s4 + $0x118] sm:$0xff] %v1272_v26  ;;  %1206 = vmatmul.bf16.gmra.mxu3 %v760_v25  ;;  %v385_v27 = vpop.f32.mrf.mxu0 }
 0x239   :  { %v554_v28 = vpop.f32.mrf.mxu1  ;;  %v386_v33 = vadd.f32 %v385_v27, %v1703_v58 }
 0x23a   :  { %v998_v29 = vpop.f32.mrf.mxu2  ;;  %v555_v34 = vadd.f32 %v554_v28, %v1706_v59 }
 0x23b   :  { %v1167_v30 = vpop.f32.mrf.mxu3  ;;  %v687_v40 = vmax.f32 %v386_v33, 0.0 }
 0x23c   :  { %v1168_v31 = vadd.f32 %v1167_v30, %v998_v29  ;;  %v688_v43 = vmax.f32 %v555_v34, 0.0 }
 0x23e   :  { %v1273_v32 = vmax.f32 %v1168_v31, 0.0 }
 0x240   :  { %1337 = vst [vmem:[%s2217_s4 + $0x120] sm:$0xff] %v1273_v32  ;;  %v387_v35 = vpop.f32.mrf.mxu0 }
 0x241   :  { %v388_v36 = vadd.f32 %v387_v35, %v1703_v58  ;;  %v556_v37 = vpop.f32.mrf.mxu1 }
 0x242   :  { %v557_v38 = vadd.f32 %v556_v37, %v1706_v59  ;;  %v1000_v39 = vpop.f32.mrf.mxu2 }
 0x243   :  { %v689_v41 = vmax.f32 %v388_v36, 0.0  ;;  %v1169_v42 = vpop.f32.mrf.mxu3 }
 0x244   :  { %v690_v44 = vmax.f32 %v557_v38, 0.0  ;;  %v1170_v45 = vadd.f32 %v1169_v42, %v1000_v39 }
 0x245   :  { %v761_v46 = vpack.c.bf16 %v689_v41, %v687_v40 }
 0x246   :  { %v762_v47 = vpack.c.bf16 %v690_v44, %v688_v43  ;;  %v1274_v48 = vmax.f32 %v1170_v45, 0.0 }
 0x247   :  { %1042 = vmatmul.bf16.gmra.mxu2 %v761_v46 }
 0x248   :  { %1338 = vst [vmem:[%s2217_s4 + $0x128] sm:$0xff] %v1274_v48  ;;  %1211 = vmatmul.bf16.gmra.mxu3 %v762_v47  ;;  %v390_v49 = vpop.f32.mrf.mxu0 }
 0x249   :  { %v559_v50 = vpop.f32.mrf.mxu1  ;;  %v391_v55 = vadd.f32 %v390_v49, %v1703_v58 }
 0x24a   :  { %v1003_v51 = vpop.f32.mrf.mxu2  ;;  %v560_v56 = vadd.f32 %v559_v50, %v1706_v59 }
 0x24b   :  { %v1172_v52 = vpop.f32.mrf.mxu3  ;;  %v691_v0 = vmax.f32 %v391_v55, 0.0 }
 0x24c   :  { %v1173_v53 = vadd.f32 %v1172_v52, %v1003_v51  ;;  %v692_v3 = vmax.f32 %v560_v56, 0.0 }
 0x24e   :  { %v1275_v54 = vmax.f32 %v1173_v53, 0.0 }
 0x250   :  { %1339 = vst [vmem:[%s2217_s4 + $0x130] sm:$0xff] %v1275_v54  ;;  %v392_v57 = vpop.f32.mrf.mxu0 }
 0x251   :  { %v393_v60 = vadd.f32 %v392_v57, %v1703_v58  ;;  %v561_v61 = vpop.f32.mrf.mxu1 }
 0x252   :  { %v562_v62 = vadd.f32 %v561_v61, %v1706_v59  ;;  %v1005_v63 = vpop.f32.mrf.mxu2 }
 0x253   :  { %v693_v1 = vmax.f32 %v393_v60, 0.0  ;;  %v1174_v2 = vpop.f32.mrf.mxu3 }
 0x254   :  { %v694_v4 = vmax.f32 %v562_v62, 0.0  ;;  %v1175_v5 = vadd.f32 %v1174_v2, %v1005_v63 }
 0x255   :  { %v763_v6 = vpack.c.bf16 %v693_v1, %v691_v0 }
 0x256   :  { %v764_v7 = vpack.c.bf16 %v694_v4, %v692_v3  ;;  %v1276_v8 = vmax.f32 %v1175_v5, 0.0 }
 0x257   :  { %1047 = vmatmul.bf16.gmra.mxu2 %v763_v6 }
 0x258   :  { %1340 = vst [vmem:[%s2217_s4 + $0x138] sm:$0xff] %v1276_v8  ;;  %1216 = vmatmul.bf16.gmra.mxu3 %v764_v7  ;;  %v395_v9 = vpop.f32.mrf.mxu0 }
 0x259   :  { %v564_v10 = vpop.f32.mrf.mxu1  ;;  %v396_v15 = vadd.f32 %v395_v9, %v1703_v58 }
 0x25a   :  { %v1008_v11 = vpop.f32.mrf.mxu2  ;;  %v565_v16 = vadd.f32 %v564_v10, %v1706_v59 }
 0x25b   :  { %v1177_v12 = vpop.f32.mrf.mxu3  ;;  %v695_v22 = vmax.f32 %v396_v15, 0.0 }
 0x25c   :  { %v1178_v13 = vadd.f32 %v1177_v12, %v1008_v11  ;;  %v696_v25 = vmax.f32 %v565_v16, 0.0 }
 0x25e   :  { %v1277_v14 = vmax.f32 %v1178_v13, 0.0 }
 0x260   :  { %1341 = vst [vmem:[%s2217_s4 + $0x140] sm:$0xff] %v1277_v14  ;;  %v397_v17 = vpop.f32.mrf.mxu0 }
 0x261   :  { %v398_v18 = vadd.f32 %v397_v17, %v1703_v58  ;;  %v566_v19 = vpop.f32.mrf.mxu1 }
 0x262   :  { %v567_v20 = vadd.f32 %v566_v19, %v1706_v59  ;;  %v1010_v21 = vpop.f32.mrf.mxu2 }
 0x263   :  { %v697_v23 = vmax.f32 %v398_v18, 0.0  ;;  %v1179_v24 = vpop.f32.mrf.mxu3 }
 0x264   :  { %v698_v26 = vmax.f32 %v567_v20, 0.0  ;;  %v1180_v27 = vadd.f32 %v1179_v24, %v1010_v21 }
 0x265   :  { %v765_v28 = vpack.c.bf16 %v697_v23, %v695_v22 }
 0x266   :  { %v766_v29 = vpack.c.bf16 %v698_v26, %v696_v25  ;;  %v1278_v30 = vmax.f32 %v1180_v27, 0.0 }
 0x267   :  { %1052 = vmatmul.bf16.gmra.mxu2 %v765_v28 }
 0x268   :  { %1342 = vst [vmem:[%s2217_s4 + $0x148] sm:$0xff] %v1278_v30  ;;  %1221 = vmatmul.bf16.gmra.mxu3 %v766_v29  ;;  %v400_v31 = vpop.f32.mrf.mxu0 }
 0x269   :  { %v569_v32 = vpop.f32.mrf.mxu1  ;;  %v401_v37 = vadd.f32 %v400_v31, %v1703_v58 }
 0x26a   :  { %v1013_v33 = vpop.f32.mrf.mxu2  ;;  %v570_v38 = vadd.f32 %v569_v32, %v1706_v59 }
 0x26b   :  { %v1182_v34 = vpop.f32.mrf.mxu3  ;;  %v699_v44 = vmax.f32 %v401_v37, 0.0 }
 0x26c   :  { %v1183_v35 = vadd.f32 %v1182_v34, %v1013_v33  ;;  %v700_v47 = vmax.f32 %v570_v38, 0.0 }
 0x26e   :  { %v1279_v36 = vmax.f32 %v1183_v35, 0.0 }
 0x270   :  { %1343 = vst [vmem:[%s2217_s4 + $0x150] sm:$0xff] %v1279_v36  ;;  %v402_v39 = vpop.f32.mrf.mxu0 }
 0x271   :  { %v403_v40 = vadd.f32 %v402_v39, %v1703_v58  ;;  %v571_v41 = vpop.f32.mrf.mxu1 }
 0x272   :  { %v572_v42 = vadd.f32 %v571_v41, %v1706_v59  ;;  %v1015_v43 = vpop.f32.mrf.mxu2 }
 0x273   :  { %v701_v45 = vmax.f32 %v403_v40, 0.0  ;;  %v1184_v46 = vpop.f32.mrf.mxu3 }
 0x274   :  { %v702_v48 = vmax.f32 %v572_v42, 0.0  ;;  %v1185_v49 = vadd.f32 %v1184_v46, %v1015_v43 }
 0x275   :  { %v767_v50 = vpack.c.bf16 %v701_v45, %v699_v44 }
 0x276   :  { %v768_v51 = vpack.c.bf16 %v702_v48, %v700_v47  ;;  %v1280_v52 = vmax.f32 %v1185_v49, 0.0 }
 0x277   :  { %1057 = vmatmul.bf16.gmra.mxu2 %v767_v50 }
 0x278   :  { %1344 = vst [vmem:[%s2217_s4 + $0x158] sm:$0xff] %v1280_v52  ;;  %1226 = vmatmul.bf16.gmra.mxu3 %v768_v51  ;;  %v405_v53 = vpop.f32.mrf.mxu0 }
 0x279   :  { %v574_v54 = vpop.f32.mrf.mxu1  ;;  %v406_v61 = vadd.f32 %v405_v53, %v1703_v58 }
 0x27a   :  { %v1018_v55 = vpop.f32.mrf.mxu2  ;;  %v575_v62 = vadd.f32 %v574_v54, %v1706_v59 }
 0x27b   :  { %v1187_v56 = vpop.f32.mrf.mxu3  ;;  %v703_v4 = vmax.f32 %v406_v61, 0.0 }
 0x27c   :  { %v1188_v57 = vadd.f32 %v1187_v56, %v1018_v55  ;;  %v704_v7 = vmax.f32 %v575_v62, 0.0 }
 0x27e   :  { %v1281_v60 = vmax.f32 %v1188_v57, 0.0 }
 0x280   :  { %1345 = vst [vmem:[%s2217_s4 + $0x160] sm:$0xff] %v1281_v60  ;;  %v407_v63 = vpop.f32.mrf.mxu0 }
 0x281   :  { %v408_v0 = vadd.f32 %v407_v63, %v1703_v58  ;;  %v576_v1 = vpop.f32.mrf.mxu1 }
 0x282   :  { %v577_v2 = vadd.f32 %v576_v1, %v1706_v59  ;;  %v1020_v3 = vpop.f32.mrf.mxu2 }
 0x283   :  { %v705_v5 = vmax.f32 %v408_v0, 0.0  ;;  %v1189_v6 = vpop.f32.mrf.mxu3 }
 0x284   :  { %v706_v8 = vmax.f32 %v577_v2, 0.0  ;;  %v1190_v9 = vadd.f32 %v1189_v6, %v1020_v3 }
 0x285   :  { %v769_v10 = vpack.c.bf16 %v705_v5, %v703_v4 }
 0x286   :  { %v770_v11 = vpack.c.bf16 %v706_v8, %v704_v7  ;;  %v1282_v12 = vmax.f32 %v1190_v9, 0.0 }
 0x287   :  { %1062 = vmatmul.bf16.gmra.mxu2 %v769_v10 }
 0x288   :  { %1346 = vst [vmem:[%s2217_s4 + $0x168] sm:$0xff] %v1282_v12  ;;  %1231 = vmatmul.bf16.gmra.mxu3 %v770_v11 }
 0x28a   :  { %v1023_v58 = vpop.f32.mrf.mxu2 }
 0x28b   :  { %v1192_v13 = vpop.f32.mrf.mxu3 }
 0x28c   :  { %v1193_v14 = vadd.f32 %v1192_v13, %v1023_v58 }
 0x28e   :  { %v1283_v59 = vmax.f32 %v1193_v14, 0.0 }
 0x290   :  { %1347 = vst [vmem:[%s2217_s4 + $0x170] sm:$0xff] %v1283_v59 }
 0x292   :  { %v1025_v15 = vpop.f32.mrf.mxu2 }
 0x293   :  { %v1194_v16 = vpop.f32.mrf.mxu3 }
 0x294   :  { %v1195_v17 = vadd.f32 %v1194_v16, %v1025_v15 }
 0x296   :  { %v1284_v18 = vmax.f32 %v1195_v17, 0.0 }
 0x298   :  { %1348 = vst [vmem:[%s2217_s4 + $0x178] sm:$0xff] %v1284_v18 }
 0x29a   :  { %v1028_v19 = vpop.f32.mrf.mxu2 }
 0x29b   :  { %v1197_v20 = vpop.f32.mrf.mxu3 }
 0x29c   :  { %v1198_v21 = vadd.f32 %v1197_v20, %v1028_v19 }
 0x29e   :  { %v1285_v22 = vmax.f32 %v1198_v21, 0.0 }
 0x2a0   :  { %1349 = vst [vmem:[%s2217_s4 + $0x180] sm:$0xff] %v1285_v22 }
 0x2a2   :  { %v1030_v23 = vpop.f32.mrf.mxu2 }
 0x2a3   :  { %v1199_v24 = vpop.f32.mrf.mxu3 }
 0x2a4   :  { %v1200_v25 = vadd.f32 %v1199_v24, %v1030_v23 }
 0x2a6   :  { %v1286_v26 = vmax.f32 %v1200_v25, 0.0 }
 0x2a8   :  { %1350 = vst [vmem:[%s2217_s4 + $0x188] sm:$0xff] %v1286_v26 }
 0x2aa   :  { %v1033_v27 = vpop.f32.mrf.mxu2 }
 0x2ab   :  { %v1202_v28 = vpop.f32.mrf.mxu3 }
 0x2ac   :  { %v1203_v29 = vadd.f32 %v1202_v28, %v1033_v27 }
 0x2ae   :  { %v1287_v30 = vmax.f32 %v1203_v29, 0.0 }
 0x2b0   :  { %1351 = vst [vmem:[%s2217_s4 + $0x190] sm:$0xff] %v1287_v30 }
 0x2b2   :  { %v1035_v31 = vpop.f32.mrf.mxu2 }
 0x2b3   :  { %v1204_v32 = vpop.f32.mrf.mxu3 }
 0x2b4   :  { %v1205_v33 = vadd.f32 %v1204_v32, %v1035_v31 }
 0x2b6   :  { %v1288_v34 = vmax.f32 %v1205_v33, 0.0 }
 0x2b8   :  { %1352 = vst [vmem:[%s2217_s4 + $0x198] sm:$0xff] %v1288_v34 }
 0x2ba   :  { %v1038_v35 = vpop.f32.mrf.mxu2 }
 0x2bb   :  { %v1207_v36 = vpop.f32.mrf.mxu3 }
 0x2bc   :  { %v1208_v37 = vadd.f32 %v1207_v36, %v1038_v35 }
 0x2be   :  { %v1289_v38 = vmax.f32 %v1208_v37, 0.0 }
 0x2c0   :  { %1353 = vst [vmem:[%s2217_s4 + $0x1a0] sm:$0xff] %v1289_v38 }
 0x2c2   :  { %v1040_v39 = vpop.f32.mrf.mxu2 }
 0x2c3   :  { %v1209_v40 = vpop.f32.mrf.mxu3 }
 0x2c4   :  { %v1210_v41 = vadd.f32 %v1209_v40, %v1040_v39 }
 0x2c6   :  { %v1290_v42 = vmax.f32 %v1210_v41, 0.0 }
 0x2c8   :  { %1354 = vst [vmem:[%s2217_s4 + $0x1a8] sm:$0xff] %v1290_v42 }
 0x2ca   :  { %v1043_v43 = vpop.f32.mrf.mxu2 }
 0x2cb   :  { %v1212_v44 = vpop.f32.mrf.mxu3 }
 0x2cc   :  { %v1213_v45 = vadd.f32 %v1212_v44, %v1043_v43 }
 0x2ce   :  { %v1291_v46 = vmax.f32 %v1213_v45, 0.0 }
 0x2d0   :  { %1355 = vst [vmem:[%s2217_s4 + $0x1b0] sm:$0xff] %v1291_v46 }
 0x2d2   :  { %v1045_v47 = vpop.f32.mrf.mxu2 }
 0x2d3   :  { %v1214_v48 = vpop.f32.mrf.mxu3 }
 0x2d4   :  { %v1215_v49 = vadd.f32 %v1214_v48, %v1045_v47 }
 0x2d6   :  { %v1292_v50 = vmax.f32 %v1215_v49, 0.0 }
 0x2d8   :  { %1356 = vst [vmem:[%s2217_s4 + $0x1b8] sm:$0xff] %v1292_v50 }
 0x2da   :  { %v1048_v51 = vpop.f32.mrf.mxu2 }
 0x2db   :  { %v1217_v52 = vpop.f32.mrf.mxu3 }
 0x2dc   :  { %v1218_v53 = vadd.f32 %v1217_v52, %v1048_v51 }
 0x2de   :  { %v1293_v54 = vmax.f32 %v1218_v53, 0.0 }
 0x2e0   :  { %1357 = vst [vmem:[%s2217_s4 + $0x1c0] sm:$0xff] %v1293_v54 }
 0x2e2   :  { %v1050_v55 = vpop.f32.mrf.mxu2 }
 0x2e3   :  { %v1219_v56 = vpop.f32.mrf.mxu3 }
 0x2e4   :  { %v1220_v57 = vadd.f32 %v1219_v56, %v1050_v55 }
 0x2e6   :  { %v1294_v60 = vmax.f32 %v1220_v57, 0.0 }
 0x2e8   :  { %1358 = vst [vmem:[%s2217_s4 + $0x1c8] sm:$0xff] %v1294_v60 }
 0x2ea   :  { %v1053_v61 = vpop.f32.mrf.mxu2 }
 0x2eb   :  { %v1222_v62 = vpop.f32.mrf.mxu3 }
 0x2ec   :  { %v1223_v63 = vadd.f32 %v1222_v62, %v1053_v61 }
 0x2ee   :  { %v1295_v0 = vmax.f32 %v1223_v63, 0.0 }
 0x2f0   :  { %1359 = vst [vmem:[%s2217_s4 + $0x1d0] sm:$0xff] %v1295_v0 }
 0x2f2   :  { %v1055_v1 = vpop.f32.mrf.mxu2 }
 0x2f3   :  { %v1224_v2 = vpop.f32.mrf.mxu3 }
 0x2f4   :  { %v1225_v3 = vadd.f32 %v1224_v2, %v1055_v1 }
 0x2f6   :  { %v1296_v4 = vmax.f32 %v1225_v3, 0.0 }
 0x2f8   :  { %1360 = vst [vmem:[%s2217_s4 + $0x1d8] sm:$0xff] %v1296_v4 }
 0x2fa   :  { %v1058_v5 = vpop.f32.mrf.mxu2 }
 0x2fb   :  { %v1227_v6 = vpop.f32.mrf.mxu3 }
 0x2fc   :  { %v1228_v7 = vadd.f32 %v1227_v6, %v1058_v5 }
 0x2fe   :  { %v1297_v8 = vmax.f32 %v1228_v7, 0.0 }
 0x300   :  { %1361 = vst [vmem:[%s2217_s4 + $0x1e0] sm:$0xff] %v1297_v8 }
 0x302   :  { %v1060_v9 = vpop.f32.mrf.mxu2 }
 0x303   :  { %v1229_v10 = vpop.f32.mrf.mxu3 }
 0x304   :  { %v1230_v11 = vadd.f32 %v1229_v10, %v1060_v9 }
 0x306   :  { %v1298_v12 = vmax.f32 %v1230_v11, 0.0 }
 0x308   :  { %1362 = vst [vmem:[%s2217_s4 + $0x1e8] sm:$0xff] %v1298_v12 }
 0x30a   :  { %v1063_v58 = vpop.f32.mrf.mxu2 }
 0x30b   :  { %v1232_v13 = vpop.f32.mrf.mxu3 }
 0x30c   :  { %v1233_v14 = vadd.f32 %v1232_v13, %v1063_v58 }
 0x30e   :  { %v1299_v59 = vmax.f32 %v1233_v14, 0.0 }
 0x310   :  { %1363 = vst [vmem:[%s2217_s4 + $0x1f0] sm:$0xff] %v1299_v59 }
 0x312   :  { %v1065_v15 = vpop.f32.mrf.mxu2 }
 0x313   :  { %v1234_v16 = vpop.f32.mrf.mxu3 }
 0x314   :  { %v1235_v17 = vadd.f32 %v1234_v16, %v1065_v15 }
 0x316   :  { %v1300_v18 = vmax.f32 %v1235_v17, 0.0 }
 0x318   :  { %1364 = vst [vmem:[%s2217_s4 + $0x1f8] sm:$0xff] %v1300_v18 }

</bundles_post_ra>
